<compile_context>
chip_gen: v6e
topology: v6e:2x2x1
jax: 0.10.0
libtpu: 0.0.40
codegen_flags: <defaults>
</compile_context>

<pallas_src>
import math

import jax
import jax.numpy as jnp
from jax import lax
from jax.experimental import pallas as pl
from jax.experimental.pallas import tpu as pltpu


def _round_up(x, m):
    return ((x + m - 1) // m) * m


def _pad_to(x, shape):
    return jnp.pad(x, [(0, s - d) for s, d in zip(shape, x.shape)])


# ----------------------------------------------------------------------------
# Fused EGAT kernel: grid = (num_edge_tiles,)
# ----------------------------------------------------------------------------
def _egat_kernel(
    # inputs
    node_ref, eaugT_ref, g0T_ref, g1T_ref, p_ref, ps_ref, hpbd_ref,
    wsdv_ref, bsdv_ref, we1_ref, be1_ref, we2_ref, be2_ref,
    wue_ref, bue_ref, wup_ref, bup_ref, wga_ref, wgb_ref, bg_ref,
    gn1w_ref, gn1b_ref, gn1m_ref, wf1_ref, bf1_ref, wf2_ref, bf2_ref,
    gn2w_ref, gn2b_ref, gn2m_ref,
    # outputs
    node_out_ref, edge_out_ref,
    # scratch
    sdv_scr, m_scr, s_scr, acc_scr,
):
    f32, bf16 = jnp.float32, jnp.bfloat16
    t = pl.program_id(0)
    n_t = pl.num_programs(0)
    Hp = node_out_ref.shape[1]

    dn_t = (((0,), (0,)), ((), ()))     # contract the leading dim of both operands

    # ---- first tile: node encodings [src | val | dst/sqrt(dh)] + softmax state reset ----
    @pl.when(t == 0)
    def _():
        nb = node_ref[...].astype(bf16)
        sdv = jnp.dot(nb, wsdv_ref[...], preferred_element_type=f32) + bsdv_ref[...]
        sdv_scr[...] = sdv.astype(bf16)
        m_scr[...] = jnp.zeros_like(m_scr)      # logits are L1 norms >= 0, so 0 is a floor
        s_scr[...] = jnp.zeros_like(s_scr)
        acc_scr[...] = jnp.zeros_like(acc_scr)

    # ---- edge phase (every tile) ----
    # int8 one-hots -> bf16 via f32 (robust two-step convert)
    g0 = g0T_ref[...].astype(f32).astype(bf16)   # (N, TE) destination (edge_index[0]) one-hot
    g1 = g1T_ref[...].astype(f32).astype(bf16)   # (N, TE) source      (edge_index[1]) one-hot

    # edge_layer: Linear -> Dropout(id) -> LeakyReLU -> Linear
    e = jax.nn.leaky_relu(
        lax.dot_general(eaugT_ref[...], we1_ref[...], dn_t, preferred_element_type=f32)
        + be1_ref[...])
    edge_feat = jnp.dot(e.astype(bf16), we2_ref[...], preferred_element_type=f32) + be2_ref[...]

    # gathers: contract the node axis of the transposed one-hots (bf16 ops, f32 acc)
    sv = lax.dot_general(g1, sdv_scr[:, 0:2 * Hp], dn_t, preferred_element_type=f32)   # (TE, 2Hp)
    src_j = sv[:, 0:Hp]
    val_j = sv[:, Hp:2 * Hp]
    dst_i = lax.dot_general(g0, sdv_scr[:, 2 * Hp:3 * Hp], dn_t, preferred_element_type=f32)

    edge_result = dst_i * (src_j * edge_feat)            # (TE, Hp); 1/sqrt(dh) folded into W_dst

    # update_edge on this tile: Linear -> Dropout(id)  -> streamed output
    edge_out_ref[...] = (
        jnp.dot(edge_result.astype(bf16), wue_ref[...], preferred_element_type=f32)
        + bue_ref[...]).astype(edge_out_ref.dtype)

    # per-head L1 logit, already broadcast across the head's dh lanes (block-diag ones)
    alpha = jnp.dot(jnp.abs(edge_result).astype(bf16), hpbd_ref[...],
                    preferred_element_type=f32)          # (TE, Hp)

    # online segment softmax over edge tiles with a running global per-head max
    # (shift-invariant -> identical to the per-destination softmax up to exp underflow).
    m_old = m_scr[...]
    m_new = jnp.maximum(m_old, jnp.max(alpha, axis=0, keepdims=True))

    @pl.when(jnp.any(m_new > m_old))
    def _():                                             # rescale only when the max moved
        corr = jnp.exp(m_old - m_new)
        s_scr[...] = s_scr[...] * corr
        acc_scr[...] = acc_scr[...] * corr

    m_scr[...] = m_new
    exp_a = jnp.exp(alpha - m_new)                       # (TE, Hp)

    # scatter-add over destination nodes: (N, TE) @ (TE, Hp)
    s_scr[...] = s_scr[...] + jnp.dot(g0, exp_a.astype(bf16), preferred_element_type=f32)
    acc_scr[...] = acc_scr[...] + jnp.dot(g0, (exp_a * val_j).astype(bf16),
                                          preferred_element_type=f32)

    # ---- node phase (last tile) ----
    @pl.when(t == n_t - 1)
    def _():
        node_in = node_ref[...]                          # (N, Hp) f32
        p = p_ref[...]                                   # (B, N) graph membership one-hot
        ps = ps_ref[...]                                 # (B, N) / nodes-per-graph

        # softmax(edge_weight) * value, scatter-summed and normalized
        agg = acc_scr[...] * pl.reciprocal(s_scr[...] + 1e-16, approx=True)

        # update_node: Linear -> Dropout(id)
        node_new = (jnp.dot(agg.astype(bf16), wup_ref[...], preferred_element_type=f32)
                    + bup_ref[...])

        # gate = sigmoid(cat([n_new, n, n_new - n]) @ Wg + b) folded into two (Hp,Hp) matmuls
        gate = jax.nn.sigmoid(
            jnp.dot(node_new.astype(bf16), wga_ref[...], preferred_element_type=f32)
            + jnp.dot(node_in.astype(bf16), wgb_ref[...], preferred_element_type=f32)
            + bg_ref[...])

        def graph_norm(x, gw, gb, gm):
            # per-graph per-channel stats via membership matmuls (kept in f32)
            mean = jnp.dot(ps, x, preferred_element_type=f32)                 # (B, Hp)
            mean_n = lax.dot_general(p, mean, dn_t, preferred_element_type=f32)
            out = x - mean_n * gm
            var = jnp.dot(ps, out * out, preferred_element_type=f32)
            var_n = lax.dot_general(p, var, dn_t, preferred_element_type=f32)
            return gw * out * lax.rsqrt(var_n + 1e-5) + gb

        x1 = graph_norm(gate * node_new + node_in, gn1w_ref[...], gn1b_ref[...], gn1m_ref[...])
        # fix_node: Linear -> Dropout(id) -> LeakyReLU -> Linear
        fx = (jnp.dot(
                  jax.nn.leaky_relu(
                      jnp.dot(x1.astype(bf16), wf1_ref[...], preferred_element_type=f32)
                      + bf1_ref[...]).astype(bf16),
                  wf2_ref[...], preferred_element_type=f32) + bf2_ref[...])
        x2 = graph_norm(gate * fx + x1, gn2w_ref[...], gn2b_ref[...], gn2m_ref[...])

        node_out_ref[...] = x2.astype(node_out_ref.dtype)


# ----------------------------------------------------------------------------
# Parameter init (matches nn.Linear's uniform(-1/sqrt(fan_in), 1/sqrt(fan_in)))
# ----------------------------------------------------------------------------
def _init_linear(key, fan_in, fan_out):
    kw, kb = jax.random.split(key)
    bound = 1.0 / math.sqrt(fan_in)
    w = jax.random.uniform(kw, (fan_in, fan_out), jnp.float32, -bound, bound)
    b = jax.random.uniform(kb, (1, fan_out), jnp.float32, -bound, bound)
    return w, b


def init_egat_params(key, dim_in, hidden_dim, edge_in, edge_out, num_head=4):
    assert dim_in == hidden_dim, "EGAT's gate / residual path requires dim_in == hidden_dim"
    assert hidden_dim % num_head == 0
    keys = iter(jax.random.split(key, 12))

    def lin(fi, fo):
        return _init_linear(next(keys), fi, fo)

    H = hidden_dim
    gn = lambda: (jnp.ones((1, H), jnp.float32),    # weight
                  jnp.zeros((1, H), jnp.float32),   # bias
                  jnp.ones((1, H), jnp.float32))    # mean_scale
    return dict(
        src=lin(H, H), dst=lin(H, H), val=lin(H, H),
        edge1=lin(edge_in + 1, H), edge2=lin(H, H),
        upd=lin(H, H), uedge=lin(H, edge_out), gate=lin(3 * H, H),
        gn1=gn(), fix1=lin(H, H), fix2=lin(H, H), gn2=gn(),
    )


# ----------------------------------------------------------------------------
# Forward:  node(N,H), edge(E,edge_in), edge_index(2,E), coords(N,3), batch(N,)
#   -> (node_new(N,H), edge_new(E,edge_out), coords)
# ----------------------------------------------------------------------------
def egat_forward(params, node, edge, edge_index, coords, batch, num_graphs,
                 num_head=4, edge_tile=None):
    f32, bf16 = jnp.float32, jnp.bfloat16

    N, H = node.shape
    K = num_head
    dh = H // K
    E = edge_index.shape[1]
    Fdim = edge.shape[1] + 1
    Eo = params["uedge"][0].shape[1]
    B = int(num_graphs)
    Hp = _round_up(H, 128)                 # lane-dense hidden width (zero-padded)

    i_idx, j_idx = edge_index[0], edge_index[1]

    # ---- per-generation VMEM budget and edge-tile size ----
    try:
        vmem_cap = int(pltpu.get_tpu_info().vmem_capacity_bytes)
    except Exception:                      # fallback if the query is unavailable
        vmem_cap = 64 * 1024 * 1024
    vmem_budget = int(vmem_cap * 0.8)      # leave headroom (esp. the 64 MiB v7x)

    if edge_tile is None:
        # constant-index blocks + scratch (conservatively counted double-buffered)
        const_bytes = 2 * (N * Hp * 4 + 2 * B * N * 4 + Hp * Hp * 2
                           + Hp * 3 * Hp * 2 + 7 * Hp * Hp * 2
                           + Fdim * Hp * 2 + Hp * Eo * 2 + 20 * Hp * 4)
        scratch_bytes = N * 3 * Hp * 2 + 2 * N * Hp * 4 + Hp * 4
        per_edge = 2 * (2 * N * 1 + Fdim * 2 + Eo * 4)   # double-buffered edge streams
        avail = max(vmem_budget - const_bytes - scratch_bytes, 0)
        edge_tile = max(128, min(4096, (avail // max(per_edge, 1)) // 128 * 128))
    TE = min(_round_up(edge_tile, 128), _round_up(E, 128))
    E_pad = _round_up(E, TE)
    T = E_pad // TE

    # ---- edge-side operands: edge axis on lanes; one-hots int8 (halved HBM bytes) ----
    node_ids = jnp.arange(N)
    g0T = _pad_to((node_ids[:, None] == i_idx[None, :]).astype(jnp.int8), (N, E_pad))
    g1T = _pad_to((node_ids[:, None] == j_idx[None, :]).astype(jnp.int8), (N, E_pad))

    dist = jnp.sqrt(jnp.sum((coords[i_idx] - coords[j_idx]) ** 2, axis=-1, keepdims=True))
    edge_aug = jnp.concatenate([edge.astype(f32), 0.1 * dist], axis=-1)      # (E, F)
    eaugT = _pad_to(edge_aug.T, (Fdim, E_pad)).astype(bf16)

    # graph membership and its mean-scaled version for GraphNorm
    p = (jnp.arange(B)[:, None] == batch[None, :]).astype(f32)               # (B, N)
    p_scaled = p / jnp.maximum(jnp.sum(p, axis=1, keepdims=True), 1.0)

    # block-diagonal head matrix: broadcasts each head's L1 across its dh lanes
    hid = jnp.arange(Hp)
    valid = hid < H
    hp_bd = (((hid[:, None] // dh) == (hid[None, :] // dh))
             & valid[:, None] & valid[None, :]).astype(bf16)                 # (Hp, Hp)

    # ---- fold / pad weights (zero-padded to Hp lanes; bf16 matmul operands) ----
    scale = 1.0 / math.sqrt(dh)

    def padw(w):        # (fi, H) -> (fi or Hp, Hp) bf16
        fi = Hp if w.shape[0] == H else w.shape[0]
        return _pad_to(w, (fi, Hp)).astype(bf16)

    def padb(b):        # (1, H) -> (1, Hp) f32
        return _pad_to(b, (1, Hp)).astype(f32)

    w_sdv = jnp.concatenate([padw(params["src"][0]), padw(params["val"][0]),
                             padw(params["dst"][0] * scale)], axis=1)        # (Hp, 3Hp)
    b_sdv = jnp.concatenate([padb(params["src"][1]), padb(params["val"][1]),
                             padb(params["dst"][1] * scale)], axis=1)        # (1, 3Hp)

    we1, be1 = padw(params["edge1"][0]), padb(params["edge1"][1])
    we2, be2 = padw(params["edge2"][0]), padb(params["edge2"][1])
    wue = _pad_to(params["uedge"][0], (Hp, Eo)).astype(bf16)
    bue = params["uedge"][1].astype(f32)
    wup, bup = padw(params["upd"][0]), padb(params["upd"][1])
    wg, bgv = params["gate"]
    wga = padw(wg[0:H] + wg[2 * H:3 * H])          # acts on node_new
    wgb = padw(wg[H:2 * H] - wg[2 * H:3 * H])      # acts on node
    bg = padb(bgv)
    gn1w, gn1b, gn1m = (padb(x) for x in params["gn1"])
    wf1, bf1 = padw(params["fix1"][0]), padb(params["fix1"][1])
    wf2, bf2 = padw(params["fix2"][0]), padb(params["fix2"][1])
    gn2w, gn2b, gn2m = (padb(x) for x in params["gn2"])

    node_p = _pad_to(node.astype(f32), (N, Hp))

    # ---- specs ----
    cs = lambda t: (0, 0)                 # resident / layer-invariant blocks
    es = lambda t: (0, t)                 # edge-tiled blocks (edge axis last)

    in_specs = [
        pl.BlockSpec((N, Hp), cs),                 # node (padded)
        pl.BlockSpec((Fdim, TE), es),              # edge features^T (bf16)
        pl.BlockSpec((N, TE), es),                 # g0^T (dest one-hot, int8)
        pl.BlockSpec((N, TE), es),                 # g1^T (src  one-hot, int8)
        pl.BlockSpec((B, N), cs),                  # p
        pl.BlockSpec((B, N), cs),                  # p_scaled
        pl.BlockSpec((Hp, Hp), cs),                # head block-diag
        pl.BlockSpec((Hp, 3 * Hp), cs), pl.BlockSpec((1, 3 * Hp), cs),       # w/b sdv
        pl.BlockSpec((Fdim, Hp), cs), pl.BlockSpec((1, Hp), cs),             # edge1
        pl.BlockSpec((Hp, Hp), cs), pl.BlockSpec((1, Hp), cs),               # edge2
        pl.BlockSpec((Hp, Eo), cs), pl.BlockSpec((1, Eo), cs),               # update_edge
        pl.BlockSpec((Hp, Hp), cs), pl.BlockSpec((1, Hp), cs),               # update_node
        pl.BlockSpec((Hp, Hp), cs), pl.BlockSpec((Hp, Hp), cs),              # gate (folded)
        pl.BlockSpec((1, Hp), cs),                                           # gate bias
        pl.BlockSpec((1, Hp), cs), pl.BlockSpec((1, Hp), cs), pl.BlockSpec((1, Hp), cs),  # gn1
        pl.BlockSpec((Hp, Hp), cs), pl.BlockSpec((1, Hp), cs),               # fix1
        pl.BlockSpec((Hp, Hp), cs), pl.BlockSpec((1, Hp), cs),               # fix2
        pl.BlockSpec((1, Hp), cs), pl.BlockSpec((1, Hp), cs), pl.BlockSpec((1, Hp), cs),  # gn2
    ]
    out_specs = (pl.BlockSpec((N, Hp), cs),                  # node_new (resident)
                 pl.BlockSpec((TE, Eo), lambda t: (t, 0)))   # edge_new (streamed per tile)
    out_shape = (jax.ShapeDtypeStruct((N, Hp), f32),
                 jax.ShapeDtypeStruct((E_pad, Eo), f32))
    scratch_shapes = [
        pltpu.VMEM((N, 3 * Hp), bf16),     # [src | val | dst] node encodings
        pltpu.VMEM((1, Hp), f32),          # running per-head max (lane-broadcast)
        pltpu.VMEM((N, Hp), f32),          # running per-node exp-sum
        pltpu.VMEM((N, Hp), f32),          # running weighted-value accumulator
    ]

    node_out, edge_out = pl.pallas_call(
        _egat_kernel,
        out_shape=out_shape,
        grid_spec=pltpu.PrefetchScalarGridSpec(
            num_scalar_prefetch=0,
            grid=(T,),
            in_specs=in_specs,
            out_specs=out_specs,
            scratch_shapes=scratch_shapes),
        compiler_params=pltpu.CompilerParams(
            dimension_semantics=("arbitrary",),
            vmem_limit_bytes=vmem_budget),
    )(node_p, eaugT, g0T, g1T, p, p_scaled, hp_bd,
      w_sdv, b_sdv, we1, be1, we2, be2, wue, bue, wup, bup, wga, wgb, bg,
      gn1w, gn1b, gn1m, wf1, bf1, wf2, bf2, gn2w, gn2b, gn2m)

    return node_out[:, :H], edge_out[:E, :Eo], coords


# ----------------------------------------------------------------------------
# Example run
# ----------------------------------------------------------------------------
if __name__ == "__main__":
    key = jax.random.PRNGKey(0)

    hidden_nf = 32                         # dim_in == hidden_dim (required by the module)
    in_edge_nf, edge_out_nf = 4, 4
    num_head = 4
    nodes_per_graph, num_graphs = 8, 2
    N = nodes_per_graph * num_graphs

    # fully connected directed edges (no self loops) within each graph
    dst_list, src_list = [], []
    for g in range(num_graphs):
        off = g * nodes_per_graph
        for a in range(nodes_per_graph):
            for b in range(nodes_per_graph):
                if a != b:
                    dst_list.append(off + a)   # edge_index[0] (i, destination)
                    src_list.append(off + b)   # edge_index[1] (j, source)
    edge_index = jnp.array([dst_list, src_list], dtype=jnp.int32)
    E = edge_index.shape[1]

    k1, k2, k3, kp = jax.random.split(key, 4)
    node = jax.random.normal(k1, (N, hidden_nf), jnp.float32)
    edge = jax.random.normal(k2, (E, in_edge_nf), jnp.float32)
    coords = jax.random.normal(k3, (N, 3), jnp.float32)
    batch = jnp.repeat(jnp.arange(num_graphs, dtype=jnp.int32), nodes_per_graph)

    params = init_egat_params(kp, hidden_nf, hidden_nf, in_edge_nf, edge_out_nf, num_head)

    node_new, edge_new, coords_out = egat_forward(
        params, node, edge, edge_index, coords, batch, num_graphs, num_head=num_head)
    jax.block_until_ready((node_new, edge_new, coords_out))

    assert node_new.shape == (N, hidden_nf)
    assert edge_new.shape == (E, edge_out_nf)
    assert coords_out.shape == (N, 3)
    assert bool(jnp.all(jnp.isfinite(node_new)))
    assert bool(jnp.all(jnp.isfinite(edge_new)))
    print("KERNEL_OK")
</pallas_src>

<mosaic_0001>
module attributes {stable_mosaic.version = 11 : i64} {
  func.func @_egat_kernel(%arg0: i32, %arg1: memref<16x128xf32, #tpu.memory_space<vmem>>, %arg2: memref<5x128xbf16, #tpu.memory_space<vmem>>, %arg3: memref<16x128xi8, #tpu.memory_space<vmem>>, %arg4: memref<16x128xi8, #tpu.memory_space<vmem>>, %arg5: memref<2x16xf32, #tpu.memory_space<vmem>>, %arg6: memref<2x16xf32, #tpu.memory_space<vmem>>, %arg7: memref<128x128xbf16, #tpu.memory_space<vmem>>, %arg8: memref<128x384xbf16, #tpu.memory_space<vmem>>, %arg9: memref<1x384xf32, #tpu.memory_space<vmem>>, %arg10: memref<5x128xbf16, #tpu.memory_space<vmem>>, %arg11: memref<1x128xf32, #tpu.memory_space<vmem>>, %arg12: memref<128x128xbf16, #tpu.memory_space<vmem>>, %arg13: memref<1x128xf32, #tpu.memory_space<vmem>>, %arg14: memref<128x4xbf16, #tpu.memory_space<vmem>>, %arg15: memref<1x4xf32, #tpu.memory_space<vmem>>, %arg16: memref<128x128xbf16, #tpu.memory_space<vmem>>, %arg17: memref<1x128xf32, #tpu.memory_space<vmem>>, %arg18: memref<128x128xbf16, #tpu.memory_space<vmem>>, %arg19: memref<128x128xbf16, #tpu.memory_space<vmem>>, %arg20: memref<1x128xf32, #tpu.memory_space<vmem>>, %arg21: memref<1x128xf32, #tpu.memory_space<vmem>>, %arg22: memref<1x128xf32, #tpu.memory_space<vmem>>, %arg23: memref<1x128xf32, #tpu.memory_space<vmem>>, %arg24: memref<128x128xbf16, #tpu.memory_space<vmem>>, %arg25: memref<1x128xf32, #tpu.memory_space<vmem>>, %arg26: memref<128x128xbf16, #tpu.memory_space<vmem>>, %arg27: memref<1x128xf32, #tpu.memory_space<vmem>>, %arg28: memref<1x128xf32, #tpu.memory_space<vmem>>, %arg29: memref<1x128xf32, #tpu.memory_space<vmem>>, %arg30: memref<1x128xf32, #tpu.memory_space<vmem>>, %arg31: memref<16x128xf32, #tpu.memory_space<vmem>>, %arg32: memref<128x4xf32, #tpu.memory_space<vmem>>, %arg33: memref<16x384xbf16, #tpu.memory_space<vmem>>, %arg34: memref<1x128xf32, #tpu.memory_space<vmem>>, %arg35: memref<16x128xf32, #tpu.memory_space<vmem>>, %arg36: memref<16x128xf32, #tpu.memory_space<vmem>>) attributes {dimension_semantics = [#tpu.dimension_semantics<arbitrary>], iteration_bounds = array<i64: 1>, scalar_prefetch = 0 : i64, scratch_operands = 4 : i64, tpu.core_type = #tpu.core_type<tc>, window_params = [{pipeline_mode = #tpu.pipeline_mode<synchronous>, transform_indices = @transform_0, window_bounds = array<i64: 16, 128>}, {transform_indices = @transform_1, window_bounds = array<i64: 5, 128>}, {transform_indices = @transform_2, window_bounds = array<i64: 16, 128>}, {transform_indices = @transform_3, window_bounds = array<i64: 16, 128>}, {pipeline_mode = #tpu.pipeline_mode<synchronous>, transform_indices = @transform_4, window_bounds = array<i64: 2, 16>}, {pipeline_mode = #tpu.pipeline_mode<synchronous>, transform_indices = @transform_5, window_bounds = array<i64: 2, 16>}, {pipeline_mode = #tpu.pipeline_mode<synchronous>, transform_indices = @transform_6, window_bounds = array<i64: 128, 128>}, {pipeline_mode = #tpu.pipeline_mode<synchronous>, transform_indices = @transform_7, window_bounds = array<i64: 128, 384>}, {pipeline_mode = #tpu.pipeline_mode<synchronous>, transform_indices = @transform_8, window_bounds = array<i64: 1, 384>}, {pipeline_mode = #tpu.pipeline_mode<synchronous>, transform_indices = @transform_9, window_bounds = array<i64: 5, 128>}, {pipeline_mode = #tpu.pipeline_mode<synchronous>, transform_indices = @transform_10, window_bounds = array<i64: 1, 128>}, {pipeline_mode = #tpu.pipeline_mode<synchronous>, transform_indices = @transform_11, window_bounds = array<i64: 128, 128>}, {pipeline_mode = #tpu.pipeline_mode<synchronous>, transform_indices = @transform_12, window_bounds = array<i64: 1, 128>}, {pipeline_mode = #tpu.pipeline_mode<synchronous>, transform_indices = @transform_13, window_bounds = array<i64: 128, 4>}, {pipeline_mode = #tpu.pipeline_mode<synchronous>, transform_indices = @transform_14, window_bounds = array<i64: 1, 4>}, {pipeline_mode = #tpu.pipeline_mode<synchronous>, transform_indices = @transform_15, window_bounds = array<i64: 128, 128>}, {pipeline_mode = #tpu.pipeline_mode<synchronous>, transform_indices = @transform_16, window_bounds = array<i64: 1, 128>}, {pipeline_mode = #tpu.pipeline_mode<synchronous>, transform_indices = @transform_17, window_bounds = array<i64: 128, 128>}, {pipeline_mode = #tpu.pipeline_mode<synchronous>, transform_indices = @transform_18, window_bounds = array<i64: 128, 128>}, {pipeline_mode = #tpu.pipeline_mode<synchronous>, transform_indices = @transform_19, window_bounds = array<i64: 1, 128>}, {pipeline_mode = #tpu.pipeline_mode<synchronous>, transform_indices = @transform_20, window_bounds = array<i64: 1, 128>}, {pipeline_mode = #tpu.pipeline_mode<synchronous>, transform_indices = @transform_21, window_bounds = array<i64: 1, 128>}, {pipeline_mode = #tpu.pipeline_mode<synchronous>, transform_indices = @transform_22, window_bounds = array<i64: 1, 128>}, {pipeline_mode = #tpu.pipeline_mode<synchronous>, transform_indices = @transform_23, window_bounds = array<i64: 128, 128>}, {pipeline_mode = #tpu.pipeline_mode<synchronous>, transform_indices = @transform_24, window_bounds = array<i64: 1, 128>}, {pipeline_mode = #tpu.pipeline_mode<synchronous>, transform_indices = @transform_25, window_bounds = array<i64: 128, 128>}, {pipeline_mode = #tpu.pipeline_mode<synchronous>, transform_indices = @transform_26, window_bounds = array<i64: 1, 128>}, {pipeline_mode = #tpu.pipeline_mode<synchronous>, transform_indices = @transform_27, window_bounds = array<i64: 1, 128>}, {pipeline_mode = #tpu.pipeline_mode<synchronous>, transform_indices = @transform_28, window_bounds = array<i64: 1, 128>}, {pipeline_mode = #tpu.pipeline_mode<synchronous>, transform_indices = @transform_29, window_bounds = array<i64: 1, 128>}, {pipeline_mode = #tpu.pipeline_mode<synchronous>, transform_indices = @transform_30, window_bounds = array<i64: 16, 128>}, {transform_indices = @transform_31, window_bounds = array<i64: 128, 4>}]} {
    %c0_i32 = arith.constant 0 : i32
    %0 = arith.cmpi eq, %arg0, %c0_i32 : i32
    %1 = arith.extui %0 : i1 to i32
    %c0_i32_0 = arith.constant 0 : i32
    %2 = arith.cmpi ne, %1, %c0_i32_0 : i32
    scf.if %2 {
      %c0_54 = arith.constant 0 : index
      %c0_55 = arith.constant 0 : index
      %78 = vector.load %arg1[%c0_54, %c0_55] : memref<16x128xf32, #tpu.memory_space<vmem>>, vector<16x128xf32>
      %79 = arith.truncf %78 : vector<16x128xf32> to vector<16x128xbf16>
      %c0_56 = arith.constant 0 : index
      %c0_57 = arith.constant 0 : index
      %80 = vector.load %arg8[%c0_56, %c0_57] : memref<128x384xbf16, #tpu.memory_space<vmem>>, vector<128x384xbf16>
      %cst_58 = arith.constant dense<0.000000e+00> : vector<16x384xf32>
      %81 = tpu.matmul %79, %80, %cst_58 {dimension_numbers = #tpu.dot_dimension_numbers<[1], [0], [0], [1], [0, 0, 1, 1], [], []>} : vector<16x128xbf16>, vector<128x384xbf16>, vector<16x384xf32> -> vector<16x384xf32>
      %c0_59 = arith.constant 0 : index
      %c0_60 = arith.constant 0 : index
      %82 = vector.load %arg9[%c0_59, %c0_60] : memref<1x384xf32, #tpu.memory_space<vmem>>, vector<1x384xf32>
      %83 = vector.broadcast %82 : vector<1x384xf32> to vector<16x384xf32>
      %84 = arith.addf %81, %83 : vector<16x384xf32>
      %85 = arith.truncf %84 : vector<16x384xf32> to vector<16x384xbf16>
      %c0_61 = arith.constant 0 : index
      %c0_62 = arith.constant 0 : index
      %86 = vector.load %arg33[%c0_61, %c0_62] : memref<16x384xbf16, #tpu.memory_space<vmem>>, vector<16x384xbf16>
      tpu.vector_store %arg33[%c0_61, %c0_62], %85 {strides = array<i32>} : memref<16x384xbf16, #tpu.memory_space<vmem>>, vector<16x384xbf16>,
      %cst_63 = arith.constant 0.000000e+00 : f32
      %87 = vector.broadcast %cst_63 : f32 to vector<1x128xf32>
      %c0_64 = arith.constant 0 : index
      %c0_65 = arith.constant 0 : index
      %88 = vector.load %arg34[%c0_64, %c0_65] : memref<1x128xf32, #tpu.memory_space<vmem>>, vector<1x128xf32>
      tpu.vector_store %arg34[%c0_64, %c0_65], %87 {strides = array<i32>} : memref<1x128xf32, #tpu.memory_space<vmem>>, vector<1x128xf32>,
      %cst_66 = arith.constant 0.000000e+00 : f32
      %89 = vector.broadcast %cst_66 : f32 to vector<16x128xf32>
      %c0_67 = arith.constant 0 : index
      %c0_68 = arith.constant 0 : index
      %90 = vector.load %arg35[%c0_67, %c0_68] : memref<16x128xf32, #tpu.memory_space<vmem>>, vector<16x128xf32>
      tpu.vector_store %arg35[%c0_67, %c0_68], %89 {strides = array<i32>} : memref<16x128xf32, #tpu.memory_space<vmem>>, vector<16x128xf32>,
      %cst_69 = arith.constant 0.000000e+00 : f32
      %91 = vector.broadcast %cst_69 : f32 to vector<16x128xf32>
      %c0_70 = arith.constant 0 : index
      %c0_71 = arith.constant 0 : index
      %92 = vector.load %arg36[%c0_70, %c0_71] : memref<16x128xf32, #tpu.memory_space<vmem>>, vector<16x128xf32>
      tpu.vector_store %arg36[%c0_70, %c0_71], %91 {strides = array<i32>} : memref<16x128xf32, #tpu.memory_space<vmem>>, vector<16x128xf32>,
    } else {
    }
    %c0 = arith.constant 0 : index
    %c0_1 = arith.constant 0 : index
    %3 = vector.load %arg3[%c0, %c0_1] : memref<16x128xi8, #tpu.memory_space<vmem>>, vector<16x128xi8>
    %4 = arith.sitofp %3 : vector<16x128xi8> to vector<16x128xf32>
    %5 = arith.truncf %4 : vector<16x128xf32> to vector<16x128xbf16>
    %c0_2 = arith.constant 0 : index
    %c0_3 = arith.constant 0 : index
    %6 = vector.load %arg4[%c0_2, %c0_3] : memref<16x128xi8, #tpu.memory_space<vmem>>, vector<16x128xi8>
    %7 = arith.sitofp %6 : vector<16x128xi8> to vector<16x128xf32>
    %8 = arith.truncf %7 : vector<16x128xf32> to vector<16x128xbf16>
    %c0_4 = arith.constant 0 : index
    %c0_5 = arith.constant 0 : index
    %9 = vector.load %arg2[%c0_4, %c0_5] : memref<5x128xbf16, #tpu.memory_space<vmem>>, vector<5x128xbf16>
    %c0_6 = arith.constant 0 : index
    %c0_7 = arith.constant 0 : index
    %10 = vector.load %arg10[%c0_6, %c0_7] : memref<5x128xbf16, #tpu.memory_space<vmem>>, vector<5x128xbf16>
    %cst = arith.constant dense<0.000000e+00> : vector<128x128xf32>
    %11 = tpu.matmul %9, %10, %cst {dimension_numbers = #tpu.dot_dimension_numbers<[0], [0], [1], [1], [0, 1, 1, 1], [], []>} : vector<5x128xbf16>, vector<5x128xbf16>, vector<128x128xf32> -> vector<128x128xf32>
    %c0_8 = arith.constant 0 : index
    %c0_9 = arith.constant 0 : index
    %12 = vector.load %arg11[%c0_8, %c0_9] : memref<1x128xf32, #tpu.memory_space<vmem>>, vector<1x128xf32>
    %13 = vector.broadcast %12 : vector<1x128xf32> to vector<128x128xf32>
    %14 = arith.addf %11, %13 : vector<128x128xf32>
    %cst_10 = arith.constant 0.000000e+00 : f32
    %15 = vector.broadcast %cst_10 : f32 to vector<128x128xf32>
    %16 = arith.cmpf oge, %14, %15 : vector<128x128xf32>
    %cst_11 = arith.constant 0.00999999977 : f32
    %17 = vector.broadcast %cst_11 : f32 to vector<128x128xf32>
    %18 = arith.mulf %17, %14 : vector<128x128xf32>
    %19 = arith.select %16, %14, %18 : vector<128x128xi1>, vector<128x128xf32>
    %20 = arith.truncf %19 : vector<128x128xf32> to vector<128x128xbf16>
    %c0_12 = arith.constant 0 : index
    %c0_13 = arith.constant 0 : index
    %21 = vector.load %arg12[%c0_12, %c0_13] : memref<128x128xbf16, #tpu.memory_space<vmem>>, vector<128x128xbf16>
    %cst_14 = arith.constant dense<0.000000e+00> : vector<128x128xf32>
    %22 = tpu.matmul %20, %21, %cst_14 {dimension_numbers = #tpu.dot_dimension_numbers<[1], [0], [0], [1], [0, 0, 1, 1], [], []>} : vector<128x128xbf16>, vector<128x128xbf16>, vector<128x128xf32> -> vector<128x128xf32>
    %c0_15 = arith.constant 0 : index
    %c0_16 = arith.constant 0 : index
    %23 = vector.load %arg13[%c0_15, %c0_16] : memref<1x128xf32, #tpu.memory_space<vmem>>, vector<1x128xf32>
    %24 = vector.broadcast %23 : vector<1x128xf32> to vector<128x128xf32>
    %25 = arith.addf %22, %24 : vector<128x128xf32>
    %c0_17 = arith.constant 0 : index
    %c0_18 = arith.constant 0 : index
    %26 = vector.load %arg33[%c0_17, %c0_18] : memref<16x384xbf16, #tpu.memory_space<vmem>>, vector<16x256xbf16>
    %cst_19 = arith.constant dense<0.000000e+00> : vector<128x256xf32>
    %27 = tpu.matmul %8, %26, %cst_19 {dimension_numbers = #tpu.dot_dimension_numbers<[0], [0], [1], [1], [0, 1, 1, 1], [], []>} : vector<16x128xbf16>, vector<16x256xbf16>, vector<128x256xf32> -> vector<128x256xf32>
    %28 = vector.extract_strided_slice %27 {offsets = [0, 0], sizes = [128, 128], strides = [1, 1]} : vector<128x256xf32> to vector<128x128xf32>
    %29 = vector.extract_strided_slice %27 {offsets = [0, 128], sizes = [128, 128], strides = [1, 1]} : vector<128x256xf32> to vector<128x128xf32>
    %c0_20 = arith.constant 0 : index
    %c256 = arith.constant 256 : index
    %30 = vector.load %arg33[%c0_20, %c256] : memref<16x384xbf16, #tpu.memory_space<vmem>>, vector<16x128xbf16>
    %cst_21 = arith.constant dense<0.000000e+00> : vector<128x128xf32>
    %31 = tpu.matmul %5, %30, %cst_21 {dimension_numbers = #tpu.dot_dimension_numbers<[0], [0], [1], [1], [0, 1, 1, 1], [], []>} : vector<16x128xbf16>, vector<16x128xbf16>, vector<128x128xf32> -> vector<128x128xf32>
    %32 = arith.mulf %28, %25 : vector<128x128xf32>
    %33 = arith.mulf %31, %32 : vector<128x128xf32>
    %34 = arith.truncf %33 : vector<128x128xf32> to vector<128x128xbf16>
    %c0_22 = arith.constant 0 : index
    %c0_23 = arith.constant 0 : index
    %35 = vector.load %arg14[%c0_22, %c0_23] : memref<128x4xbf16, #tpu.memory_space<vmem>>, vector<128x4xbf16>
    %cst_24 = arith.constant dense<0.000000e+00> : vector<128x4xf32>
    %36 = tpu.matmul %34, %35, %cst_24 {dimension_numbers = #tpu.dot_dimension_numbers<[1], [0], [0], [1], [0, 0, 1, 1], [], []>} : vector<128x128xbf16>, vector<128x4xbf16>, vector<128x4xf32> -> vector<128x4xf32>
    %c0_25 = arith.constant 0 : index
    %c0_26 = arith.constant 0 : index
    %37 = vector.load %arg15[%c0_25, %c0_26] : memref<1x4xf32, #tpu.memory_space<vmem>>, vector<1x4xf32>
    %38 = vector.broadcast %37 : vector<1x4xf32> to vector<128x4xf32>
    %39 = arith.addf %36, %38 : vector<128x4xf32>
    %c0_27 = arith.constant 0 : index
    %c0_28 = arith.constant 0 : index
    %40 = vector.load %arg32[%c0_27, %c0_28] : memref<128x4xf32, #tpu.memory_space<vmem>>, vector<128x4xf32>
    tpu.vector_store %arg32[%c0_27, %c0_28], %39 {strides = array<i32>} : memref<128x4xf32, #tpu.memory_space<vmem>>, vector<128x4xf32>,
    %41 = math.absf %33 : vector<128x128xf32>
    %42 = arith.truncf %41 : vector<128x128xf32> to vector<128x128xbf16>
    %c0_29 = arith.constant 0 : index
    %c0_30 = arith.constant 0 : index
    %43 = vector.load %arg7[%c0_29, %c0_30] : memref<128x128xbf16, #tpu.memory_space<vmem>>, vector<128x128xbf16>
    %cst_31 = arith.constant dense<0.000000e+00> : vector<128x128xf32>
    %44 = tpu.matmul %42, %43, %cst_31 {dimension_numbers = #tpu.dot_dimension_numbers<[1], [0], [0], [1], [0, 0, 1, 1], [], []>} : vector<128x128xbf16>, vector<128x128xbf16>, vector<128x128xf32> -> vector<128x128xf32>
    %c0_32 = arith.constant 0 : index
    %c0_33 = arith.constant 0 : index
    %45 = vector.load %arg34[%c0_32, %c0_33] : memref<1x128xf32, #tpu.memory_space<vmem>>, vector<1x128xf32>
    %cst_34 = arith.constant dense<0xFF800000> : vector<128xf32>
    %46 = vector.multi_reduction <maximumf>, %44, %cst_34 [0] : vector<128x128xf32> to vector<128xf32>
    %47 = vector.shape_cast %46 : vector<128xf32> to vector<1x128xf32>
    %48 = arith.maximumf %45, %47 : vector<1x128xf32>
    %49 = arith.cmpf ogt, %48, %45 : vector<1x128xf32>
    %cst_35 = arith.constant 1.000000e+00 : f32
    %cst_36 = arith.constant 0.000000e+00 : f32
    %50 = vector.broadcast %cst_35 : f32 to vector<1x128xf32>
    %51 = vector.broadcast %cst_36 : f32 to vector<1x128xf32>
    %52 = arith.select %49, %50, %51 : vector<1x128xi1>, vector<1x128xf32>
    %53 = vector.shape_cast %52 : vector<1x128xf32> to vector<1x1x128xf32>
    %cst_37 = arith.constant dense<0xFF800000> : vector<1xf32>
    %54 = vector.multi_reduction <maximumf>, %53, %cst_37 [1, 2] : vector<1x1x128xf32> to vector<1xf32>
    %55 = vector.shape_cast %54 : vector<1xf32> to vector<1x1x1xf32>
    %56 = vector.extract %55[0, 0, 0] : f32 from vector<1x1x1xf32>
    %cst_38 = arith.constant 0.000000e+00 : f32
    %57 = arith.cmpf ogt, %56, %cst_38 : f32
    %58 = arith.extui %57 : i1 to i32
    %c0_i32_39 = arith.constant 0 : i32
    %59 = arith.cmpi ne, %58, %c0_i32_39 : i32
    scf.if %59 {
      %78 = arith.subf %45, %48 : vector<1x128xf32>
      %79 = math.exp %78 : vector<1x128xf32>
      %c0_54 = arith.constant 0 : index
      %c0_55 = arith.constant 0 : index
      %80 = vector.load %arg35[%c0_54, %c0_55] : memref<16x128xf32, #tpu.memory_space<vmem>>, vector<16x128xf32>
      %81 = vector.broadcast %79 : vector<1x128xf32> to vector<16x128xf32>
      %82 = arith.mulf %80, %81 : vector<16x128xf32>
      %c0_56 = arith.constant 0 : index
      %c0_57 = arith.constant 0 : index
      %83 = vector.load %arg35[%c0_56, %c0_57] : memref<16x128xf32, #tpu.memory_space<vmem>>, vector<16x128xf32>
      tpu.vector_store %arg35[%c0_56, %c0_57], %82 {strides = array<i32>} : memref<16x128xf32, #tpu.memory_space<vmem>>, vector<16x128xf32>,
      %c0_58 = arith.constant 0 : index
      %c0_59 = arith.constant 0 : index
      %84 = vector.load %arg36[%c0_58, %c0_59] : memref<16x128xf32, #tpu.memory_space<vmem>>, vector<16x128xf32>
      %85 = vector.broadcast %79 : vector<1x128xf32> to vector<16x128xf32>
      %86 = arith.mulf %84, %85 : vector<16x128xf32>
      %c0_60 = arith.constant 0 : index
      %c0_61 = arith.constant 0 : index
      %87 = vector.load %arg36[%c0_60, %c0_61] : memref<16x128xf32, #tpu.memory_space<vmem>>, vector<16x128xf32>
      tpu.vector_store %arg36[%c0_60, %c0_61], %86 {strides = array<i32>} : memref<16x128xf32, #tpu.memory_space<vmem>>, vector<16x128xf32>,
    } else {
    }
    %c0_40 = arith.constant 0 : index
    %c0_41 = arith.constant 0 : index
    %60 = vector.load %arg34[%c0_40, %c0_41] : memref<1x128xf32, #tpu.memory_space<vmem>>, vector<1x128xf32>
    tpu.vector_store %arg34[%c0_40, %c0_41], %48 {strides = array<i32>} : memref<1x128xf32, #tpu.memory_space<vmem>>, vector<1x128xf32>,
    %61 = vector.broadcast %48 : vector<1x128xf32> to vector<128x128xf32>
    %62 = arith.subf %44, %61 : vector<128x128xf32>
    %63 = math.exp %62 : vector<128x128xf32>
    %c0_42 = arith.constant 0 : index
    %c0_43 = arith.constant 0 : index
    %64 = vector.load %arg35[%c0_42, %c0_43] : memref<16x128xf32, #tpu.memory_space<vmem>>, vector<16x128xf32>
    %65 = arith.truncf %63 : vector<128x128xf32> to vector<128x128xbf16>
    %cst_44 = arith.constant dense<0.000000e+00> : vector<16x128xf32>
    %66 = tpu.matmul %5, %65, %cst_44 {dimension_numbers = #tpu.dot_dimension_numbers<[1], [0], [0], [1], [0, 0, 1, 1], [], []>} : vector<16x128xbf16>, vector<128x128xbf16>, vector<16x128xf32> -> vector<16x128xf32>
    %67 = arith.addf %64, %66 : vector<16x128xf32>
    %c0_45 = arith.constant 0 : index
    %c0_46 = arith.constant 0 : index
    %68 = vector.load %arg35[%c0_45, %c0_46] : memref<16x128xf32, #tpu.memory_space<vmem>>, vector<16x128xf32>
    tpu.vector_store %arg35[%c0_45, %c0_46], %67 {strides = array<i32>} : memref<16x128xf32, #tpu.memory_space<vmem>>, vector<16x128xf32>,
    %c0_47 = arith.constant 0 : index
    %c0_48 = arith.constant 0 : index
    %69 = vector.load %arg36[%c0_47, %c0_48] : memref<16x128xf32, #tpu.memory_space<vmem>>, vector<16x128xf32>
    %70 = arith.mulf %63, %29 : vector<128x128xf32>
    %71 = arith.truncf %70 : vector<128x128xf32> to vector<128x128xbf16>
    %cst_49 = arith.constant dense<0.000000e+00> : vector<16x128xf32>
    %72 = tpu.matmul %5, %71, %cst_49 {dimension_numbers = #tpu.dot_dimension_numbers<[1], [0], [0], [1], [0, 0, 1, 1], [], []>} : vector<16x128xbf16>, vector<128x128xbf16>, vector<16x128xf32> -> vector<16x128xf32>
    %73 = arith.addf %69, %72 : vector<16x128xf32>
    %c0_50 = arith.constant 0 : index
    %c0_51 = arith.constant 0 : index
    %74 = vector.load %arg36[%c0_50, %c0_51] : memref<16x128xf32, #tpu.memory_space<vmem>>, vector<16x128xf32>
    tpu.vector_store %arg36[%c0_50, %c0_51], %73 {strides = array<i32>} : memref<16x128xf32, #tpu.memory_space<vmem>>, vector<16x128xf32>,
    %c0_i32_52 = arith.constant 0 : i32
    %75 = arith.cmpi eq, %arg0, %c0_i32_52 : i32
    %76 = arith.extui %75 : i1 to i32
    %c0_i32_53 = arith.constant 0 : i32
    %77 = arith.cmpi ne, %76, %c0_i32_53 : i32
    scf.if %77 {
      %c0_54 = arith.constant 0 : index
      %c0_55 = arith.constant 0 : index
      %78 = vector.load %arg1[%c0_54, %c0_55] : memref<16x128xf32, #tpu.memory_space<vmem>>, vector<16x128xf32>
      %c0_56 = arith.constant 0 : index
      %c0_57 = arith.constant 0 : index
      %79 = vector.load %arg5[%c0_56, %c0_57] : memref<2x16xf32, #tpu.memory_space<vmem>>, vector<2x16xf32>
      %c0_58 = arith.constant 0 : index
      %c0_59 = arith.constant 0 : index
      %80 = vector.load %arg6[%c0_58, %c0_59] : memref<2x16xf32, #tpu.memory_space<vmem>>, vector<2x16xf32>
      %c0_60 = arith.constant 0 : index
      %c0_61 = arith.constant 0 : index
      %81 = vector.load %arg36[%c0_60, %c0_61] : memref<16x128xf32, #tpu.memory_space<vmem>>, vector<16x128xf32>
      %c0_62 = arith.constant 0 : index
      %c0_63 = arith.constant 0 : index
      %82 = vector.load %arg35[%c0_62, %c0_63] : memref<16x128xf32, #tpu.memory_space<vmem>>, vector<16x128xf32>
      %cst_64 = arith.constant 1.000000e-16 : f32
      %83 = vector.broadcast %cst_64 : f32 to vector<16x128xf32>
      %84 = arith.addf %82, %83 : vector<16x128xf32>
      %85 = tpu.reciprocal %84 {approx = true} : vector<16x128xf32> -> vector<16x128xf32>
      %86 = arith.mulf %81, %85 : vector<16x128xf32>
      %87 = arith.truncf %86 : vector<16x128xf32> to vector<16x128xbf16>
      %c0_65 = arith.constant 0 : index
      %c0_66 = arith.constant 0 : index
      %88 = vector.load %arg16[%c0_65, %c0_66] : memref<128x128xbf16, #tpu.memory_space<vmem>>, vector<128x128xbf16>
      %cst_67 = arith.constant dense<0.000000e+00> : vector<16x128xf32>
      %89 = tpu.matmul %87, %88, %cst_67 {dimension_numbers = #tpu.dot_dimension_numbers<[1], [0], [0], [1], [0, 0, 1, 1], [], []>} : vector<16x128xbf16>, vector<128x128xbf16>, vector<16x128xf32> -> vector<16x128xf32>
      %c0_68 = arith.constant 0 : index
      %c0_69 = arith.constant 0 : index
      %90 = vector.load %arg17[%c0_68, %c0_69] : memref<1x128xf32, #tpu.memory_space<vmem>>, vector<1x128xf32>
      %91 = vector.broadcast %90 : vector<1x128xf32> to vector<16x128xf32>
      %92 = arith.addf %89, %91 : vector<16x128xf32>
      %93 = arith.truncf %92 : vector<16x128xf32> to vector<16x128xbf16>
      %c0_70 = arith.constant 0 : index
      %c0_71 = arith.constant 0 : index
      %94 = vector.load %arg18[%c0_70, %c0_71] : memref<128x128xbf16, #tpu.memory_space<vmem>>, vector<128x128xbf16>
      %cst_72 = arith.constant dense<0.000000e+00> : vector<16x128xf32>
      %95 = tpu.matmul %93, %94, %cst_72 {dimension_numbers = #tpu.dot_dimension_numbers<[1], [0], [0], [1], [0, 0, 1, 1], [], []>} : vector<16x128xbf16>, vector<128x128xbf16>, vector<16x128xf32> -> vector<16x128xf32>
      %96 = arith.truncf %78 : vector<16x128xf32> to vector<16x128xbf16>
      %c0_73 = arith.constant 0 : index
      %c0_74 = arith.constant 0 : index
      %97 = vector.load %arg19[%c0_73, %c0_74] : memref<128x128xbf16, #tpu.memory_space<vmem>>, vector<128x128xbf16>
      %cst_75 = arith.constant dense<0.000000e+00> : vector<16x128xf32>
      %98 = tpu.matmul %96, %97, %cst_75 {dimension_numbers = #tpu.dot_dimension_numbers<[1], [0], [0], [1], [0, 0, 1, 1], [], []>} : vector<16x128xbf16>, vector<128x128xbf16>, vector<16x128xf32> -> vector<16x128xf32>
      %99 = arith.addf %95, %98 : vector<16x128xf32>
      %c0_76 = arith.constant 0 : index
      %c0_77 = arith.constant 0 : index
      %100 = vector.load %arg20[%c0_76, %c0_77] : memref<1x128xf32, #tpu.memory_space<vmem>>, vector<1x128xf32>
      %101 = vector.broadcast %100 : vector<1x128xf32> to vector<16x128xf32>
      %102 = arith.addf %99, %101 : vector<16x128xf32>
      %103 = arith.negf %102 : vector<16x128xf32>
      %104 = math.exp %103 : vector<16x128xf32>
      %cst_78 = arith.constant 1.000000e+00 : f32
      %105 = vector.broadcast %cst_78 : f32 to vector<16x128xf32>
      %106 = arith.addf %105, %104 : vector<16x128xf32>
      %107 = arith.divf %105, %106 : vector<16x128xf32>
      %108 = arith.mulf %107, %92 : vector<16x128xf32>
      %109 = arith.addf %108, %78 : vector<16x128xf32>
      %c0_79 = arith.constant 0 : index
      %c0_80 = arith.constant 0 : index
      %110 = vector.load %arg21[%c0_79, %c0_80] : memref<1x128xf32, #tpu.memory_space<vmem>>, vector<1x128xf32>
      %c0_81 = arith.constant 0 : index
      %c0_82 = arith.constant 0 : index
      %111 = vector.load %arg22[%c0_81, %c0_82] : memref<1x128xf32, #tpu.memory_space<vmem>>, vector<1x128xf32>
      %c0_83 = arith.constant 0 : index
      %c0_84 = arith.constant 0 : index
      %112 = vector.load %arg23[%c0_83, %c0_84] : memref<1x128xf32, #tpu.memory_space<vmem>>, vector<1x128xf32>
      %cst_85 = arith.constant dense<0.000000e+00> : vector<2x128xf32>
      %113 = tpu.matmul %80, %109, %cst_85 {dimension_numbers = #tpu.dot_dimension_numbers<[1], [0], [0], [1], [0, 0, 1, 1], [], []>} : vector<2x16xf32>, vector<16x128xf32>, vector<2x128xf32> -> vector<2x128xf32>
      %cst_86 = arith.constant dense<0.000000e+00> : vector<16x128xf32>
      %114 = tpu.matmul %79, %113, %cst_86 {dimension_numbers = #tpu.dot_dimension_numbers<[0], [0], [1], [1], [0, 1, 1, 1], [], []>} : vector<2x16xf32>, vector<2x128xf32>, vector<16x128xf32> -> vector<16x128xf32>
      %115 = vector.broadcast %112 : vector<1x128xf32> to vector<16x128xf32>
      %116 = arith.mulf %114, %115 : vector<16x128xf32>
      %117 = arith.subf %109, %116 : vector<16x128xf32>
      %118 = arith.mulf %117, %117 : vector<16x128xf32>
      %cst_87 = arith.constant dense<0.000000e+00> : vector<2x128xf32>
      %119 = tpu.matmul %80, %118, %cst_87 {dimension_numbers = #tpu.dot_dimension_numbers<[1], [0], [0], [1], [0, 0, 1, 1], [], []>} : vector<2x16xf32>, vector<16x128xf32>, vector<2x128xf32> -> vector<2x128xf32>
      %cst_88 = arith.constant dense<0.000000e+00> : vector<16x128xf32>
      %120 = tpu.matmul %79, %119, %cst_88 {dimension_numbers = #tpu.dot_dimension_numbers<[0], [0], [1], [1], [0, 1, 1, 1], [], []>} : vector<2x16xf32>, vector<2x128xf32>, vector<16x128xf32> -> vector<16x128xf32>
      %121 = vector.broadcast %110 : vector<1x128xf32> to vector<16x128xf32>
      %122 = arith.mulf %121, %117 : vector<16x128xf32>
      %cst_89 = arith.constant 9.99999974E-6 : f32
      %123 = vector.broadcast %cst_89 : f32 to vector<16x128xf32>
      %124 = arith.addf %120, %123 : vector<16x128xf32>
      %125 = math.rsqrt %124 : vector<16x128xf32>
      %126 = arith.mulf %122, %125 : vector<16x128xf32>
      %127 = vector.broadcast %111 : vector<1x128xf32> to vector<16x128xf32>
      %128 = arith.addf %126, %127 : vector<16x128xf32>
      %129 = arith.truncf %128 : vector<16x128xf32> to vector<16x128xbf16>
      %c0_90 = arith.constant 0 : index
      %c0_91 = arith.constant 0 : index
      %130 = vector.load %arg24[%c0_90, %c0_91] : memref<128x128xbf16, #tpu.memory_space<vmem>>, vector<128x128xbf16>
      %cst_92 = arith.constant dense<0.000000e+00> : vector<16x128xf32>
      %131 = tpu.matmul %129, %130, %cst_92 {dimension_numbers = #tpu.dot_dimension_numbers<[1], [0], [0], [1], [0, 0, 1, 1], [], []>} : vector<16x128xbf16>, vector<128x128xbf16>, vector<16x128xf32> -> vector<16x128xf32>
      %c0_93 = arith.constant 0 : index
      %c0_94 = arith.constant 0 : index
      %132 = vector.load %arg25[%c0_93, %c0_94] : memref<1x128xf32, #tpu.memory_space<vmem>>, vector<1x128xf32>
      %133 = vector.broadcast %132 : vector<1x128xf32> to vector<16x128xf32>
      %134 = arith.addf %131, %133 : vector<16x128xf32>
      %cst_95 = arith.constant 0.000000e+00 : f32
      %135 = vector.broadcast %cst_95 : f32 to vector<16x128xf32>
      %136 = arith.cmpf oge, %134, %135 : vector<16x128xf32>
      %cst_96 = arith.constant 0.00999999977 : f32
      %137 = vector.broadcast %cst_96 : f32 to vector<16x128xf32>
      %138 = arith.mulf %137, %134 : vector<16x128xf32>
      %139 = arith.select %136, %134, %138 : vector<16x128xi1>, vector<16x128xf32>
      %140 = arith.truncf %139 : vector<16x128xf32> to vector<16x128xbf16>
      %c0_97 = arith.constant 0 : index
      %c0_98 = arith.constant 0 : index
      %141 = vector.load %arg26[%c0_97, %c0_98] : memref<128x128xbf16, #tpu.memory_space<vmem>>, vector<128x128xbf16>
      %cst_99 = arith.constant dense<0.000000e+00> : vector<16x128xf32>
      %142 = tpu.matmul %140, %141, %cst_99 {dimension_numbers = #tpu.dot_dimension_numbers<[1], [0], [0], [1], [0, 0, 1, 1], [], []>} : vector<16x128xbf16>, vector<128x128xbf16>, vector<16x128xf32> -> vector<16x128xf32>
      %c0_100 = arith.constant 0 : index
      %c0_101 = arith.constant 0 : index
      %143 = vector.load %arg27[%c0_100, %c0_101] : memref<1x128xf32, #tpu.memory_space<vmem>>, vector<1x128xf32>
      %144 = vector.broadcast %143 : vector<1x128xf32> to vector<16x128xf32>
      %145 = arith.addf %142, %144 : vector<16x128xf32>
      %146 = arith.mulf %107, %145 : vector<16x128xf32>
      %147 = arith.addf %146, %128 : vector<16x128xf32>
      %c0_102 = arith.constant 0 : index
      %c0_103 = arith.constant 0 : index
      %148 = vector.load %arg28[%c0_102, %c0_103] : memref<1x128xf32, #tpu.memory_space<vmem>>, vector<1x128xf32>
      %c0_104 = arith.constant 0 : index
      %c0_105 = arith.constant 0 : index
      %149 = vector.load %arg29[%c0_104, %c0_105] : memref<1x128xf32, #tpu.memory_space<vmem>>, vector<1x128xf32>
      %c0_106 = arith.constant 0 : index
      %c0_107 = arith.constant 0 : index
      %150 = vector.load %arg30[%c0_106, %c0_107] : memref<1x128xf32, #tpu.memory_space<vmem>>, vector<1x128xf32>
      %cst_108 = arith.constant dense<0.000000e+00> : vector<2x128xf32>
      %151 = tpu.matmul %80, %147, %cst_108 {dimension_numbers = #tpu.dot_dimension_numbers<[1], [0], [0], [1], [0, 0, 1, 1], [], []>} : vector<2x16xf32>, vector<16x128xf32>, vector<2x128xf32> -> vector<2x128xf32>
      %cst_109 = arith.constant dense<0.000000e+00> : vector<16x128xf32>
      %152 = tpu.matmul %79, %151, %cst_109 {dimension_numbers = #tpu.dot_dimension_numbers<[0], [0], [1], [1], [0, 1, 1, 1], [], []>} : vector<2x16xf32>, vector<2x128xf32>, vector<16x128xf32> -> vector<16x128xf32>
      %153 = vector.broadcast %150 : vector<1x128xf32> to vector<16x128xf32>
      %154 = arith.mulf %152, %153 : vector<16x128xf32>
      %155 = arith.subf %147, %154 : vector<16x128xf32>
      %156 = arith.mulf %155, %155 : vector<16x128xf32>
      %cst_110 = arith.constant dense<0.000000e+00> : vector<2x128xf32>
      %157 = tpu.matmul %80, %156, %cst_110 {dimension_numbers = #tpu.dot_dimension_numbers<[1], [0], [0], [1], [0, 0, 1, 1], [], []>} : vector<2x16xf32>, vector<16x128xf32>, vector<2x128xf32> -> vector<2x128xf32>
      %cst_111 = arith.constant dense<0.000000e+00> : vector<16x128xf32>
      %158 = tpu.matmul %79, %157, %cst_111 {dimension_numbers = #tpu.dot_dimension_numbers<[0], [0], [1], [1], [0, 1, 1, 1], [], []>} : vector<2x16xf32>, vector<2x128xf32>, vector<16x128xf32> -> vector<16x128xf32>
      %159 = vector.broadcast %148 : vector<1x128xf32> to vector<16x128xf32>
      %160 = arith.mulf %159, %155 : vector<16x128xf32>
      %cst_112 = arith.constant 9.99999974E-6 : f32
      %161 = vector.broadcast %cst_112 : f32 to vector<16x128xf32>
      %162 = arith.addf %158, %161 : vector<16x128xf32>
      %163 = math.rsqrt %162 : vector<16x128xf32>
      %164 = arith.mulf %160, %163 : vector<16x128xf32>
      %165 = vector.broadcast %149 : vector<1x128xf32> to vector<16x128xf32>
      %166 = arith.addf %164, %165 : vector<16x128xf32>
      %c0_113 = arith.constant 0 : index
      %c0_114 = arith.constant 0 : index
      %167 = vector.load %arg31[%c0_113, %c0_114] : memref<16x128xf32, #tpu.memory_space<vmem>>, vector<16x128xf32>
      tpu.vector_store %arg31[%c0_113, %c0_114], %166 {strides = array<i32>} : memref<16x128xf32, #tpu.memory_space<vmem>>, vector<16x128xf32>,
    } else {
    }
    return
  }
  func.func @transform_0(%arg0: i32) -> (i32, i32) {
    %c0_i32 = arith.constant 0 : i32
    %c0_i32_0 = arith.constant 0 : i32
    %c0_i32_1 = arith.constant 0 : i32
    return %c0_i32, %c0_i32_0 : i32, i32
  }
  func.func @transform_1(%arg0: i32) -> (i32, i32) {
    %c0_i32 = arith.constant 0 : i32
    %c0_i32_0 = arith.constant 0 : i32
    return %c0_i32, %arg0 : i32, i32
  }
  func.func @transform_2(%arg0: i32) -> (i32, i32) {
    %c0_i32 = arith.constant 0 : i32
    %c0_i32_0 = arith.constant 0 : i32
    return %c0_i32, %arg0 : i32, i32
  }
  func.func @transform_3(%arg0: i32) -> (i32, i32) {
    %c0_i32 = arith.constant 0 : i32
    %c0_i32_0 = arith.constant 0 : i32
    return %c0_i32, %arg0 : i32, i32
  }
  func.func @transform_4(%arg0: i32) -> (i32, i32) {
    %c0_i32 = arith.constant 0 : i32
    %c0_i32_0 = arith.constant 0 : i32
    %c0_i32_1 = arith.constant 0 : i32
    return %c0_i32, %c0_i32_0 : i32, i32
  }
  func.func @transform_5(%arg0: i32) -> (i32, i32) {
    %c0_i32 = arith.constant 0 : i32
    %c0_i32_0 = arith.constant 0 : i32
    %c0_i32_1 = arith.constant 0 : i32
    return %c0_i32, %c0_i32_0 : i32, i32
  }
  func.func @transform_6(%arg0: i32) -> (i32, i32) {
    %c0_i32 = arith.constant 0 : i32
    %c0_i32_0 = arith.constant 0 : i32
    %c0_i32_1 = arith.constant 0 : i32
    return %c0_i32, %c0_i32_0 : i32, i32
  }
  func.func @transform_7(%arg0: i32) -> (i32, i32) {
    %c0_i32 = arith.constant 0 : i32
    %c0_i32_0 = arith.constant 0 : i32
    %c0_i32_1 = arith.constant 0 : i32
    return %c0_i32, %c0_i32_0 : i32, i32
  }
  func.func @transform_8(%arg0: i32) -> (i32, i32) {
    %c0_i32 = arith.constant 0 : i32
    %c0_i32_0 = arith.constant 0 : i32
    %c0_i32_1 = arith.constant 0 : i32
    return %c0_i32, %c0_i32_0 : i32, i32
  }
  func.func @transform_9(%arg0: i32) -> (i32, i32) {
    %c0_i32 = arith.constant 0 : i32
    %c0_i32_0 = arith.constant 0 : i32
    %c0_i32_1 = arith.constant 0 : i32
    return %c0_i32, %c0_i32_0 : i32, i32
  }
  func.func @transform_10(%arg0: i32) -> (i32, i32) {
    %c0_i32 = arith.constant 0 : i32
    %c0_i32_0 = arith.constant 0 : i32
    %c0_i32_1 = arith.constant 0 : i32
    return %c0_i32, %c0_i32_0 : i32, i32
  }
  func.func @transform_11(%arg0: i32) -> (i32, i32) {
    %c0_i32 = arith.constant 0 : i32
    %c0_i32_0 = arith.constant 0 : i32
    %c0_i32_1 = arith.constant 0 : i32
    return %c0_i32, %c0_i32_0 : i32, i32
  }
  func.func @transform_12(%arg0: i32) -> (i32, i32) {
    %c0_i32 = arith.constant 0 : i32
    %c0_i32_0 = arith.constant 0 : i32
    %c0_i32_1 = arith.constant 0 : i32
    return %c0_i32, %c0_i32_0 : i32, i32
  }
  func.func @transform_13(%arg0: i32) -> (i32, i32) {
    %c0_i32 = arith.constant 0 : i32
    %c0_i32_0 = arith.constant 0 : i32
    %c0_i32_1 = arith.constant 0 : i32
    return %c0_i32, %c0_i32_0 : i32, i32
  }
  func.func @transform_14(%arg0: i32) -> (i32, i32) {
    %c0_i32 = arith.constant 0 : i32
    %c0_i32_0 = arith.constant 0 : i32
    %c0_i32_1 = arith.constant 0 : i32
    return %c0_i32, %c0_i32_0 : i32, i32
  }
  func.func @transform_15(%arg0: i32) -> (i32, i32) {
    %c0_i32 = arith.constant 0 : i32
    %c0_i32_0 = arith.constant 0 : i32
    %c0_i32_1 = arith.constant 0 : i32
    return %c0_i32, %c0_i32_0 : i32, i32
  }
  func.func @transform_16(%arg0: i32) -> (i32, i32) {
    %c0_i32 = arith.constant 0 : i32
    %c0_i32_0 = arith.constant 0 : i32
    %c0_i32_1 = arith.constant 0 : i32
    return %c0_i32, %c0_i32_0 : i32, i32
  }
  func.func @transform_17(%arg0: i32) -> (i32, i32) {
    %c0_i32 = arith.constant 0 : i32
    %c0_i32_0 = arith.constant 0 : i32
    %c0_i32_1 = arith.constant 0 : i32
    return %c0_i32, %c0_i32_0 : i32, i32
  }
  func.func @transform_18(%arg0: i32) -> (i32, i32) {
    %c0_i32 = arith.constant 0 : i32
    %c0_i32_0 = arith.constant 0 : i32
    %c0_i32_1 = arith.constant 0 : i32
    return %c0_i32, %c0_i32_0 : i32, i32
  }
  func.func @transform_19(%arg0: i32) -> (i32, i32) {
    %c0_i32 = arith.constant 0 : i32
    %c0_i32_0 = arith.constant 0 : i32
    %c0_i32_1 = arith.constant 0 : i32
    return %c0_i32, %c0_i32_0 : i32, i32
  }
  func.func @transform_20(%arg0: i32) -> (i32, i32) {
    %c0_i32 = arith.constant 0 : i32
    %c0_i32_0 = arith.constant 0 : i32
    %c0_i32_1 = arith.constant 0 : i32
    return %c0_i32, %c0_i32_0 : i32, i32
  }
  func.func @transform_21(%arg0: i32) -> (i32, i32) {
    %c0_i32 = arith.constant 0 : i32
    %c0_i32_0 = arith.constant 0 : i32
    %c0_i32_1 = arith.constant 0 : i32
    return %c0_i32, %c0_i32_0 : i32, i32
  }
  func.func @transform_22(%arg0: i32) -> (i32, i32) {
    %c0_i32 = arith.constant 0 : i32
    %c0_i32_0 = arith.constant 0 : i32
    %c0_i32_1 = arith.constant 0 : i32
    return %c0_i32, %c0_i32_0 : i32, i32
  }
  func.func @transform_23(%arg0: i32) -> (i32, i32) {
    %c0_i32 = arith.constant 0 : i32
    %c0_i32_0 = arith.constant 0 : i32
    %c0_i32_1 = arith.constant 0 : i32
    return %c0_i32, %c0_i32_0 : i32, i32
  }
  func.func @transform_24(%arg0: i32) -> (i32, i32) {
    %c0_i32 = arith.constant 0 : i32
    %c0_i32_0 = arith.constant 0 : i32
    %c0_i32_1 = arith.constant 0 : i32
    return %c0_i32, %c0_i32_0 : i32, i32
  }
  func.func @transform_25(%arg0: i32) -> (i32, i32) {
    %c0_i32 = arith.constant 0 : i32
    %c0_i32_0 = arith.constant 0 : i32
    %c0_i32_1 = arith.constant 0 : i32
    return %c0_i32, %c0_i32_0 : i32, i32
  }
  func.func @transform_26(%arg0: i32) -> (i32, i32) {
    %c0_i32 = arith.constant 0 : i32
    %c0_i32_0 = arith.constant 0 : i32
    %c0_i32_1 = arith.constant 0 : i32
    return %c0_i32, %c0_i32_0 : i32, i32
  }
  func.func @transform_27(%arg0: i32) -> (i32, i32) {
    %c0_i32 = arith.constant 0 : i32
    %c0_i32_0 = arith.constant 0 : i32
    %c0_i32_1 = arith.constant 0 : i32
    return %c0_i32, %c0_i32_0 : i32, i32
  }
  func.func @transform_28(%arg0: i32) -> (i32, i32) {
    %c0_i32 = arith.constant 0 : i32
    %c0_i32_0 = arith.constant 0 : i32
    %c0_i32_1 = arith.constant 0 : i32
    return %c0_i32, %c0_i32_0 : i32, i32
  }
  func.func @transform_29(%arg0: i32) -> (i32, i32) {
    %c0_i32 = arith.constant 0 : i32
    %c0_i32_0 = arith.constant 0 : i32
    %c0_i32_1 = arith.constant 0 : i32
    return %c0_i32, %c0_i32_0 : i32, i32
  }
  func.func @transform_30(%arg0: i32) -> (i32, i32) {
    %c0_i32 = arith.constant 0 : i32
    %c0_i32_0 = arith.constant 0 : i32
    %c0_i32_1 = arith.constant 0 : i32
    return %c0_i32, %c0_i32_0 : i32, i32
  }
  func.func @transform_31(%arg0: i32) -> (i32, i32) {
    %c0_i32 = arith.constant 0 : i32
    %c0_i32_0 = arith.constant 0 : i32
    return %arg0, %c0_i32 : i32, i32
  }
}

</mosaic_0001>

<bundles_post_ra>
// kernel: tpu_custom_call.1
= control target key start
LH: loop header
LB: loop body
LE: loop exit
PB: predicated region body
PF: predicated region fallthrough
CT: control target
= control target key end

     0   :  { %s4419_s6 = smov 1   ;;  %s4420_s10 = smov 2   ;;  %s5150_s0 = inlined_call_operand.smem [shape: u32[32], index: -1, kind: input, shape index: {}] }
   0x1   :  { %s4480_s5 = sld [smem:[%s5150_s0]]   ;;  %s4421_s14 = smov 3  }
   0x2   :  { %s4485_s9 = sld [smem:[%s5150_s0 + %s4419_s6]]   ;;  %s4422_s18 = smov 4  }
   0x3   :  { %s4490_s13 = sld [smem:[%s5150_s0 + %s4420_s10]]   ;;  %s4423_s22 = smov 5  }
   0x4   :  { %s4495_s17 = sld [smem:[%s5150_s0 + %s4421_s14]]   ;;  %s4424_s26 = smov 6  }
   0x5   :  { %s4500_s21 = sld [smem:[%s5150_s0 + %s4422_s18]]   ;;  %s4425_s30 = smov 7  }
   0x6   :  { %s4505_s25 = sld [smem:[%s5150_s0 + %s4423_s22]]   ;;  %s4426_s4 = smov 8  }
   0x7   :  { %s4510_s29 = sld [smem:[%s5150_s0 + %s4424_s26]]   ;;  %s4427_s10 = smov 9  }
   0x8   :  { %s4515_s3 = sld [smem:[%s5150_s0 + %s4425_s30]]   ;;  %s4428_s15 = smov 10  }
   0x9   :  { %s4520_s8 = sld [smem:[%s5150_s0 + %s4426_s4]]   ;;  %s4429_s20 = smov 11  }
   0xa   :  { %s4525_s14 = sld [smem:[%s5150_s0 + %s4427_s10]]   ;;  %s4430_s26 = smov 12  }
   0xb   :  { %s4530_s19 = sld [smem:[%s5150_s0 + %s4428_s15]]   ;;  %s4431_s1 = smov 13  }
   0xc   :  { %s4535_s24 = sld [smem:[%s5150_s0 + %s4429_s20]]   ;;  %s4432_s7 = smov 14  }
   0xd   :  { %5157 = sst [smem:[#allocation32_spill]] %s4510_s29  ;;  %s4433_s15 = smov 15  }
   0xe   :  { %s4540_s30 = sld [smem:[%s5150_s0 + %s4430_s26]]   ;;  %s4434_s22 = smov 16  }
   0xf   :  { %s4545_s6 = sld [smem:[%s5150_s0 + %s4431_s1]]   ;;  %s4435_s28 = smov 17  }
  0x10   :  { %5158 = sst [smem:[#allocation33_spill]] %s4525_s14 }
  0x11   :  { %5159 = sst [smem:[#allocation34_spill]] %s4530_s19 }
  0x12   :  { %s4550_s12 = sld [smem:[%s5150_s0 + %s4432_s7]]   ;;  %s4436_s7 = smov 18  }
  0x13   :  { %s4555_s20 = sld [smem:[%s5150_s0 + %s4433_s15]]   ;;  %s4437_s15 = smov 19  }
  0x14   :  { %5160 = sst [smem:[#allocation35_spill]] %s4540_s30 }
  0x15   :  { %5161 = sst [smem:[#allocation36_spill]] %s4545_s6 }
  0x16   :  { %s4560_s27 = sld [smem:[%s5150_s0 + %s4434_s22]]   ;;  %s4438_s22 = smov 20  }
  0x17   :  { %s4565_s4 = sld [smem:[%s5150_s0 + %s4435_s28]]   ;;  %s4439_s28 = smov 21  }
  0x18   :  { %5162 = sst [smem:[#allocation37_spill]] %s4550_s12 }
  0x19   :  { %s4570_s12 = sld [smem:[%s5150_s0 + %s4436_s7]]   ;;  %s4440_s7 = smov 22  }
  0x1a   :  { %s4575_s30 = sld [smem:[%s5150_s0 + %s4437_s15]]   ;;  %s4441_s15 = smov 23  }
  0x1b   :  { %s4585_s6 = sld [smem:[%s5150_s0 + %s4439_s28]]   ;;  %s4443_s28 = smov 25  }
  0x1c   :  { %5163 = sst [smem:[#allocation38_spill]] %s4560_s27 }
  0x1d   :  { %s4580_s27 = sld [smem:[%s5150_s0 + %s4438_s22]]   ;;  %s4442_s22 = smov 24  }
  0x1e   :  { %s4590_s29 = sld [smem:[%s5150_s0 + %s4440_s7]]   ;;  %s4444_s7 = smov 26  }
  0x20   :  { %5164 = sst [smem:[#allocation39_spill]] %s4575_s30 }
  0x21   :  { %5166 = sst [smem:[#allocation41_spill]] %s4585_s6 }
  0x22   :  { %s4595_s30 = sld [smem:[%s5150_s0 + %s4441_s15]]   ;;  %s4445_s15 = smov 27  }
  0x23   :  { %5165 = sst [smem:[#allocation40_spill]] %s4580_s27 }
  0x24   :  { %5167 = sst [smem:[#allocation42_spill]] %s4590_s29 }
  0x25   :  { %s4600_s27 = sld [smem:[%s5150_s0 + %s4442_s22]]   ;;  %s4446_s22 = smov 28  }
  0x26   :  { %s4605_s6 = sld [smem:[%s5150_s0 + %s4443_s28]]   ;;  %s4447_s28 = smov 29  }
  0x27   :  { %s4610_s29 = sld [smem:[%s5150_s0 + %s4444_s7]]   ;;  %s4448_s7 = smov 30  }
  0x28   :  { %s4615_s19 = sld [smem:[%s5150_s0 + %s4445_s15]]   ;;  %s4449_s15 = smov 31  }
  0x29   :  { %s4625_s14 = sld [smem:[%s5150_s0 + %s4447_s28]]  }
  0x2b   :  { %5168 = sst [smem:[#allocation43_spill]] %s4600_s27 }
  0x2c   :  { %s4620_s27 = sld [smem:[%s5150_s0 + %s4446_s22]]  }
  0x2d   :  { %5169 = sst [smem:[#allocation44_spill]] %s4610_s29 }
  0x2e   :  { %5170 = sst [smem:[#allocation45_spill]] %s4615_s19 }
  0x2f   :  { %s4630_s29 = sld [smem:[%s5150_s0 + %s4448_s7]]  }
  0x30   :  { %s4635_s19 = sld [smem:[%s5150_s0 + %s4449_s15]]  }
  0x31   :  { %69 = vsyncpa [#allocation7], 0 }
  0x32   :  { %70 = vsyncpa [#allocation10], 0 }
  0x33   :  { %71 = vsyncpa [#allocation13], 0 }
  0x34   :  { %72 = vsyncpa [#allocation16], 0 }
  0x35   :  { %73 = vsyncpa [#allocation19], 0 }
  0x36   :  { %74 = vsyncpa [#allocation22], 0 }
  0x37   :  { %75 = vsyncpa [#allocation8], 0  ;;  %s4450_s22 = smov [#allocation9]   ;;  %s4451_s26 = smov [#allocation12]  }
  0x38   :  { %s100_s23 = sshll.u32 %s4450_s22, 4  ;;  %s121_s28 = sshll.u32 %s4451_s26, 4  ;;  %s101_s23 = int_to_ptr.vmem [resolvable:$true] %s100_s23  ;;  %s122_s28 = int_to_ptr.vmem [resolvable:$true] %s121_s28 }
  0x39   :  { %s4173_s1 = scalar_lea.vmem %s101_s23, 32  ;;  %p4178_p1 = scmp.lt.s32.totalorder %s101_s23, %s101_s23 }
  0x3a   :  { %p4174_p0 = scmp.ne.s32.totalorder %s101_s23, %s4173_s1  ;;  %p4179_p2 = scmp.lt.s32.totalorder %s4173_s1, %s4173_s1 }
  0x3c   :  { %p4180_p3 = por %p4179_p2, %p4178_p1 }
  0x3e   :  { %p4181_p4 = pnand %p4180_p3, %p4174_p0 }
  0x40   :  { %4184 = shalt.err (!%p4181_p4)
}
  0x41   :  { %103 = dma.hbm_to_vmem [thread:$0]  %s4500_s21, 32, %s101_s23, [#allocation10]  }
  0x42   :  { %s4193_s0 = scalar_lea.vmem %s122_s28, 3072  ;;  %p4198_p6 = scmp.lt.s32.totalorder %s122_s28, %s122_s28 }
  0x43   :  { %p4194_p5 = scmp.ne.s32.totalorder %s122_s28, %s4193_s0  ;;  %p4199_p7 = scmp.lt.s32.totalorder %s4193_s0, %s4193_s0 }
  0x45   :  { %p4200_p8 = por %p4199_p7, %p4198_p6 }
  0x47   :  { %p4201_p9 = pnand %p4200_p8, %p4194_p5 }
  0x49   :  { %4204 = shalt.err (!%p4201_p9)
}
  0x4a   :  { %s4452_s2 = smov 192   ;;  %s4453_s7 = smov 12  }
  0x4b   :  { %127 = dma.hbm_to_vmem [thread:$0]  %s4515_s3, 3072, %s122_s28, [#allocation13], %s4452_s2, %s4452_s2, %s4453_s7  }
  0x4c   :  { %s4454_s10 = smov [#allocation15]  }
  0x4d   :  { %s147_s11 = sshll.u32 %s4454_s10, 4  ;;  %s148_s11 = int_to_ptr.vmem [resolvable:$true] %s147_s11 }
  0x4e   :  { %s4213_s15 = scalar_lea.vmem %s148_s11, 1024  ;;  %p4218_p11 = scmp.lt.s32.totalorder %s148_s11, %s148_s11 }
  0x4f   :  { %p4214_p10 = scmp.ne.s32.totalorder %s148_s11, %s4213_s15  ;;  %p4219_p12 = scmp.lt.s32.totalorder %s4213_s15, %s4213_s15 }
  0x51   :  { %p4220_p13 = por %p4219_p12, %p4218_p11 }
  0x53   :  { %p4221_p0 = pnand %p4220_p13, %p4214_p10 }
  0x55   :  { %4224 = shalt.err (!%p4221_p0)
}
  0x56   :  { %s4455_s21 = smov 64   ;;  %s4456_s16 = smov 4  }
  0x57   :  { %153 = dma.hbm_to_vmem [thread:$0]  %s4535_s24, 1024, %s148_s11, [#allocation16], %s4455_s21, %s4455_s21, %s4456_s16  }
  0x58   :  { %s4457_s18 = smov [#allocation18]   ;;  %s4458_s3 = smov [#allocation21]  }
  0x59   :  { %s179_s22 = sshll.u32 %s4457_s18, 4  ;;  %s211_s23 = sshll.u32 %s4458_s3, 4  ;;  %s180_s22 = int_to_ptr.vmem [resolvable:$true] %s179_s22  ;;  %s212_s23 = int_to_ptr.vmem [resolvable:$true] %s211_s23 }
  0x5a   :  { %s4233_s26 = scalar_lea.vmem %s180_s22, 1024  ;;  %p4238_p2 = scmp.lt.s32.totalorder %s180_s22, %s180_s22 }
  0x5b   :  { %p4234_p1 = scmp.ne.s32.totalorder %s180_s22, %s4233_s26  ;;  %p4239_p3 = scmp.lt.s32.totalorder %s4233_s26, %s4233_s26 }
  0x5d   :  { %p4240_p4 = por %p4239_p3, %p4238_p2 }
  0x5f   :  { %p4241_p5 = pnand %p4240_p4, %p4234_p1 }
  0x61   :  { %4244 = shalt.err (!%p4241_p5)
}
  0x62   :  { %185 = dma.hbm_to_vmem [thread:$0]  %s4565_s4, 1024, %s180_s22, [#allocation19], %s4455_s21, %s4455_s21, %s4456_s16  }
  0x63   :  { %s4253_s28 = scalar_lea.vmem %s212_s23, 1024  ;;  %p4258_p7 = scmp.lt.s32.totalorder %s212_s23, %s212_s23 }
  0x64   :  { %p4254_p6 = scmp.ne.s32.totalorder %s212_s23, %s4253_s28  ;;  %p4259_p8 = scmp.lt.s32.totalorder %s4253_s28, %s4253_s28 }
  0x66   :  { %p4260_p9 = por %p4259_p8, %p4258_p7 }
  0x68   :  { %p4261_p10 = pnand %p4260_p9, %p4254_p6 }
  0x6a   :  { %4264 = shalt.err (!%p4261_p10)
}
  0x6b   :  { %217 = dma.hbm_to_vmem [thread:$0]  %s4595_s30, 1024, %s212_s23, [#allocation22], %s4455_s21, %s4455_s21, %s4456_s16  }
  0x6c   :  { %s4459_s24 = smov [#allocation6]  }
  0x6d   :  { %s81_s1 = sshll.u32 %s4459_s24, 4  ;;  %s82_s1 = int_to_ptr.vmem [resolvable:$true] %s81_s1 }
  0x6e   :  { %s4273_s0 = scalar_lea.vmem %s82_s1, 256  ;;  %p4278_p12 = scmp.lt.s32.totalorder %s82_s1, %s82_s1 }
  0x6f   :  { %p4274_p11 = scmp.ne.s32.totalorder %s82_s1, %s4273_s0  ;;  %p4279_p13 = scmp.lt.s32.totalorder %s4273_s0, %s4273_s0 }
  0x71   :  { %p4280_p0 = por %p4279_p13, %p4278_p12 }
  0x73   :  { %p4281_p1 = pnand %p4280_p0, %p4274_p11 }
  0x75   :  { %4284 = shalt.err (!%p4281_p1)
}
  0x76   :  { %s4460_s4 = smov 128   ;;  %s4461_s2 = smov 8  }
  0x77   :  { %87 = dma.hbm_to_vmem [thread:$0]  %s4480_s5, 256, %s82_s1, [#allocation7], %s4460_s4, %s4460_s4, %s4461_s2  }
  0x78   :  { %s4462_s7 = smov [#allocation11]   ;;  %s4463_s30 = smov [#allocation14]  }
  0x79   :  { %s110_s10 = sshll.u32 %s4462_s7, 4  ;;  %s134_s11 = sshll.u32 %s4463_s30, 4  ;;  %s111_s10 = int_to_ptr.vmem [resolvable:$true] %s110_s10  ;;  %s135_s11 = int_to_ptr.vmem [resolvable:$true] %s134_s11 }
  0x7a   :  { %s4293_s15 = scalar_lea.vmem %s111_s10, 32  ;;  %p4298_p3 = scmp.lt.s32.totalorder %s111_s10, %s111_s10 }
  0x7b   :  { %p4294_p2 = scmp.ne.s32.totalorder %s111_s10, %s4293_s15  ;;  %p4299_p4 = scmp.lt.s32.totalorder %s4293_s15, %s4293_s15 }
  0x7d   :  { %p4300_p5 = por %p4299_p4, %p4298_p3 }
  0x7f   :  { %p4301_p6 = pnand %p4300_p5, %p4294_p2 }
  0x81   :  { %4304 = shalt.err (!%p4301_p6)
}
  0x82   :  { %113 = dma.hbm_to_vmem [thread:$0]  %s4505_s25, 32, %s111_s10, [#allocation10]  }
  0x83   :  { %s4313_s18 = scalar_lea.vmem %s135_s11, 48  ;;  %s4317_s22 = scalar_lea.vmem %s135_s11, 64 }
  0x84   :  { %p4314_p7 = scmp.ne.s32.totalorder %s135_s11, %s4313_s18  ;;  %p4318_p8 = scmp.lt.s32.totalorder %s135_s11, %s135_s11 }
  0x85   :  { %p4319_p9 = scmp.lt.s32.totalorder %s4317_s22, %s4313_s18 }
  0x87   :  { %p4320_p10 = por %p4319_p9, %p4318_p8 }
  0x89   :  { %p4321_p11 = pnand %p4320_p10, %p4314_p7 }
  0x8b   :  { %4324 = shalt.err (!%p4321_p11)
}
  0x8c   :  { %137 = dma.hbm_to_vmem [thread:$0]  %s4520_s8, 48, %s135_s11, [#allocation13]  }
  0x8d   :  { %s4464_s5 = smov [#allocation17]   ;;  %s4465_s23 = smov [#allocation20]  }
  0x8e   :  { %s165_s3 = sshll.u32 %s4464_s5, 4  ;;  %s191_s26 = sshll.u32 %s4465_s23, 4  ;;  %s166_s3 = int_to_ptr.vmem [resolvable:$true] %s165_s3  ;;  %s192_s26 = int_to_ptr.vmem [resolvable:$true] %s191_s26 }
  0x8f   :  { %s4333_s28 = scalar_lea.vmem %s166_s3, 1024  ;;  %p4338_p13 = scmp.lt.s32.totalorder %s166_s3, %s166_s3 }
  0x90   :  { %p4334_p12 = scmp.ne.s32.totalorder %s166_s3, %s4333_s28  ;;  %p4339_p0 = scmp.lt.s32.totalorder %s4333_s28, %s4333_s28 }
  0x92   :  { %p4340_p1 = por %p4339_p0, %p4338_p13 }
  0x94   :  { %p4341_p2 = pnand %p4340_p1, %p4334_p12 }
  0x96   :  { %4344 = shalt.err (!%p4341_p2)
}
  0x97   :  { %171 = dma.hbm_to_vmem [thread:$0]  %s4555_s20, 1024, %s166_s3, [#allocation16], %s4455_s21, %s4455_s21, %s4456_s16  }
  0x98   :  { %s4353_s25 = scalar_lea.vmem %s192_s26, 1024  ;;  %p4358_p4 = scmp.lt.s32.totalorder %s192_s26, %s192_s26 }
  0x99   :  { %p4354_p3 = scmp.ne.s32.totalorder %s192_s26, %s4353_s25  ;;  %p4359_p5 = scmp.lt.s32.totalorder %s4353_s25, %s4353_s25 }
  0x9b   :  { %p4360_p6 = por %p4359_p5, %p4358_p4 }
  0x9d   :  { %p4361_p7 = pnand %p4360_p6, %p4354_p3 }
  0x9f   :  { %4364 = shalt.err (!%p4361_p7)
}
  0xa0   :  { %197 = dma.hbm_to_vmem [thread:$0]  %s4570_s12, 1024, %s192_s26, [#allocation19], %s4455_s21, %s4455_s21, %s4456_s16  }
  0xa1   :  { %s4466_s8 = smov [#allocation23]  }
  0xa2   :  { %s225_s24 = sshll.u32 %s4466_s8, 4  ;;  %s226_s24 = int_to_ptr.vmem [resolvable:$true] %s225_s24 }
  0xa3   :  { %s4373_s1 = scalar_lea.vmem %s226_s24, 1024  ;;  %p4378_p9 = scmp.lt.s32.totalorder %s226_s24, %s226_s24 }
  0xa4   :  { %p4374_p8 = scmp.ne.s32.totalorder %s226_s24, %s4373_s1  ;;  %p4379_p10 = scmp.lt.s32.totalorder %s4373_s1, %s4373_s1 }
  0xa6   :  { %p4380_p11 = por %p4379_p10, %p4378_p9 }
  0xa8   :  { %p4381_p12 = pnand %p4380_p11, %p4374_p8 }
  0xaa   :  { %4384 = shalt.err (!%p4381_p12)
}
  0xab   :  { %231 = dma.hbm_to_vmem [thread:$0]  %s4605_s6, 1024, %s226_s24, [#allocation22], %s4455_s21, %s4455_s21, %s4456_s16  }
  0xac   :  { %4405 = dma.done.wait [#allocation7], 256  }
  0xad   :  { %4406 = vsyncadd [#allocation7], 4294967040 }
  0xae   :  { %4407 = dma.done.wait [#allocation10], 64  }
  0xaf   :  { %4408 = vsyncadd [#allocation10], 4294967232 }
  0xb0   :  { %4409 = dma.done.wait [#allocation13], 3120  }
  0xb1   :  { %4410 = vsyncadd [#allocation13], 4294964176 }
  0xb2   :  { %4411 = dma.done.wait [#allocation16], 2048  }
  0xb3   :  { %4412 = vsyncadd [#allocation16], 4294965248 }
  0xb4   :  { %4413 = dma.done.wait [#allocation19], 2048  }
  0xb5   :  { %4414 = vsyncadd [#allocation19], 4294965248 }
  0xb6   :  { %4415 = dma.done.wait [#allocation22], 2048  }
  0xb7   :  { %4416 = vsyncadd [#allocation22], 4294965248  ;;  %v4467_v0 = vmov 0   ;;  %v5153_v1 = vmov 0.0   ;;  %vm4469_vm0 = vmmov 0   ;;  %vm629_vm1 = vcmask 1041408  }
  0xb8   :  { %490 = vmatprep.mubr.bf16.mxu0 %v4467_v0  ;;  %3616 = vmatprep.subr.bf16.mxu1 %v5153_v1  ;;  %567 = vst [vmem:[#allocation4] sm:$0xff] %v5153_v1  ;;  %568 = vst [vmem:[#allocation4 + $0x8] sm:$0xff] %v5153_v1  ;;  %v579_v2 = vld [vmem:[%s4485_s9] sm:$0x7]  ;;  %v4011_v3 = vld [vmem:[#allocation12 + $0xac] ss:$12 sps:$4 sm:$0xff]   ;;  %v315_v61 = vlaneseq }
  0xb9   :  { %569 = vst [vmem:[#allocation5 + $0x8] sm:$0xff] %v5153_v1  ;;  %570 = vst [vmem:[#allocation5] sm:$0xff] %v5153_v1  ;;  %3632 = vmatprep.mubr.msk.bf16.mxu1 %vm4469_vm0, %v5153_v1  ;;  %588 = vxpose.xlu0.c.b16.start.end [1/1] (short) %v579_v2, 128  ;;  %v4013_v4 = vld [vmem:[#allocation12 + $0xa8] ss:$12 sps:$4 sm:$0xff]   ;;  %v4016_v6 = vld [vmem:[#allocation12 + $0x90] ss:$12 sps:$4 sm:$0xff]  }
  0xba   :  { %566 = vst [vmem:[#allocation3] sm:$0x1] %v5153_v1  ;;  %v4014_v5 = vld [vmem:[#allocation12 + $0x94] ss:$12 sps:$4 sm:$0xff]   ;;  %458 = vmatprep.subr.bf16.mxu0 %v4011_v3  ;;  %v4017_v7 = vld [vmem:[#allocation12 + $0x7c] ss:$12 sps:$4 sm:$0xff]  }
  0xbb   :  { %459 = vmatpush1.bf16.msra.mxu0 %v4013_v4  ;;  %v4019_v8 = vld [vmem:[#allocation12 + $0x78] ss:$12 sps:$4 sm:$0xff]   ;;  %v4022_v10 = vld [vmem:[#allocation12 + $0x60] ss:$12 sps:$4 sm:$0xff]   ;;  %vm630_vm2 = vcmask 1042432   ;;  %v4470_v11 = vmov 65535  }
  0xbc   :  { %460 = vmatprep.subr.bf16.mxu0 %v4014_v5  ;;  %v4020_v9 = vld [vmem:[#allocation12 + $0x64] ss:$12 sps:$4 sm:$0xff]   ;;  %v631_v12 = vsel %vm629_vm1, 4294967295, %v4470_v11  ;;  %v4023_v14 = vld [vmem:[#allocation12 + $0x4c] ss:$12 sps:$4 sm:$0xff]   ;;  %s5171_s9 = sld [smem:[#allocation33_spill]] }
  0xbd   :  { %v4035_v13 = vld [vmem:[#allocation12 + $0xb0] ss:$12 sps:$4 sm:$0xff]   ;;  %v4036_v15 = vld [vmem:[#allocation12 + $0x98] ss:$12 sps:$4 sm:$0xff]   ;;  %v632_v16 = vsel %vm630_vm2, %v631_v12, 0  ;;  %vm604_vm3 = vcmask 39936  }
  0xbe   :  { %3617 = vmatpush3.bf16.msra.mxu1 %v4035_v13  ;;  %v4025_v17 = vld [vmem:[#allocation12 + $0x48] ss:$12 sps:$4 sm:$0xff]   ;;  %v4037_v19 = vld [vmem:[#allocation12 + $0x80] ss:$12 sps:$4 sm:$0xff]   ;;  %v4028_v20 = vld [vmem:[#allocation12 + $0x30] ss:$12 sps:$4 sm:$0xff]  }
  0xbf   :  { %461 = vmatpush1.bf16.msra.mxu0 %v4016_v6  ;;  %3618 = vmatprep.subr.bf16.mxu1 %v5153_v1  ;;  %v4026_v18 = vld [vmem:[#allocation12 + $0x34] ss:$12 sps:$4 sm:$0xff]   ;;  %v4029_v21 = vld [vmem:[#allocation12 + $0x1c] ss:$12 sps:$4 sm:$0xff]   ;;  %v4031_v28 = vld [vmem:[#allocation12 + $0x18] ss:$12 sps:$4 sm:$0xff]  }
  0xc0   :  { %462 = vmatprep.subr.bf16.mxu0 %v4017_v7  ;;  %v575_v22 = vld [vmem:[%s4495_s17] sm:$0x3]  ;;  %v576_v23 = vld [vmem:[%s4495_s17 + $0x2] sm:$0x3]  ;;  %v4034_v36 = vld [vmem:[#allocation12] ss:$12 sps:$4 sm:$0xff]  }
  0xc1   :  { %v571_v24 = vld [vmem:[%s4490_s13] sm:$0x3]  ;;  %v572_v26 = vld [vmem:[%s4490_s13 + $0x2] sm:$0x3]  ;;  %v577_v29 = vunpack.c.l.s8.bf16 %v575_v22  ;;  %v578_v30 = vunpack.c.l.s8.bf16 %v576_v23  ;;  %v4040_v40 = vld [vmem:[#allocation12 + $0x38] ss:$12 sps:$4 sm:$0xff]  }
  0xc2   :  { %3619 = vmatpush3.bf16.msra.mxu1 %v4036_v15  ;;  %v4038_v25 = vld [vmem:[#allocation12 + $0x68] ss:$12 sps:$4 sm:$0xff]   ;;  %v573_v27 = vunpack.c.l.s8.bf16 %v571_v24  ;;  %v574_v31 = vunpack.c.l.s8.bf16 %v572_v26  ;;  %v4032_v32 = vld [vmem:[#allocation12 + $0x4] ss:$12 sps:$4 sm:$0xff]   ;;  %v4041_v43 = vld [vmem:[#allocation12 + $0x20] ss:$12 sps:$4 sm:$0xff]  }
  0xc3   :  { %463 = vmatpush1.bf16.msra.mxu0 %v4019_v8  ;;  %3620 = vmatprep.subr.bf16.mxu1 %v5153_v1  ;;  %v4039_v33 = vld [vmem:[#allocation12 + $0x50] ss:$12 sps:$4 sm:$0xff]   ;;  %v279_v38 = vld [vmem:[#allocation6 + $0x8] sm:$0xff]  ;;  %v3344_v39 = vcombine.low %v577_v29, %v578_v30  ;;  %v4046_v54 = vld [vmem:[#allocation15 + $0x20] sm:$0xff]   ;;  %v316_v62 = vshrl.u32 %v315_v61, 7  ;;  %vm991_vm4 = vcmask 130048  }
  0xc4   :  { %464 = vmatprep.subr.bf16.mxu0 %v4020_v9  ;;  %v580_v34 = vld [vmem:[%s5171_s9] sm:$0x7]  ;;  %v4688_v35 = vcombine.low %v573_v27, %v574_v31  ;;  %v4043_v49 = vld [vmem:[#allocation15 + $0x38] sm:$0xff]   ;;  %v4050_v60 = vld [vmem:[#allocation15] sm:$0xff]   ;;  %s5173_s13 = sld [smem:[#allocation34_spill]] }
  0xc5   :  { %v278_v37 = vld [vmem:[#allocation6] sm:$0xff]  ;;  %v634_v41 = vand.u32 %v632_v16, %v580_v34  ;;  %v4042_v44 = vld [vmem:[#allocation12 + $0x8] ss:$12 sps:$4 sm:$0xff]   ;;  %v4047_v56 = vld [vmem:[#allocation15 + $0x18] sm:$0xff]   ;;  %v4704_v63 = vsub.s32 0, %v316_v62  ;;  %v321_v3 = vsub.s32 1, %v316_v62 }
  0xc6   :  { %3621 = vmatpush3.bf16.msra.mxu1 %v4037_v19  ;;  %5172 = vst [vmem:[#allocation46_spill] sm:$0xff] %v4688_v35  ;;  %1137 = vxpose.xlu1.c.b16.start.end [1/1] (short) %v4688_v35, 128  ;;  %v280_v42 = vpack.c.bf16 %v279_v38, %v278_v37  ;;  %v4044_v50 = vld [vmem:[#allocation15 + $0x30] sm:$0xff]   ;;  %v4045_v52 = vld [vmem:[#allocation15 + $0x28] sm:$0xff]   ;;  %v313_v2 = vld [vmem:[#allocation14] sm:$0x7]  ;;  %s5174_s17 = sld [smem:[#allocation32_spill]] }
  0xc7   :  { %465 = vmatpush1.bf16.msra.mxu0 %v4022_v10  ;;  %3622 = vmatprep.subr.bf16.mxu1 %v5153_v1  ;;  %v4048_v58 = vld [vmem:[#allocation15 + $0x10] sm:$0xff]   ;;  %v4049_v59 = vld [vmem:[#allocation15 + $0x8] sm:$0xff]   ;;  %v318_v4 = vrot.slane %v313_v2, %v4704_v63  ;;  %v322_v5 = vrot.slane %v313_v2, %v321_v3  ;;  %v325_v10 = vsub.s32 2, %v316_v62  ;;  %s5175_s6 = sld [smem:[#allocation36_spill]] }
  0xc8   :  { %466 = vmatprep.subr.bf16.mxu0 %v4023_v14  ;;  %s5180_s12 = sld [smem:[#allocation35_spill]] }
  0xc9   :  { %v326_v15 = vrot.slane %v313_v2, %v325_v10  ;;  %s5181_s20 = sld [smem:[#allocation37_spill]] }
  0xca   :  { %3623 = vmatpush3.bf16.msra.mxu1 %v4038_v25 }
  0xcb   :  { %467 = vmatpush1.bf16.msra.mxu0 %v4025_v17  ;;  %3624 = vmatprep.subr.bf16.mxu1 %v5153_v1 }
  0xcc   :  { %468 = vmatprep.subr.bf16.mxu0 %v4026_v18 }
  0xce   :  { %3625 = vmatpush3.bf16.msra.mxu1 %v4039_v33 }
  0xcf   :  { %469 = vmatpush1.bf16.msra.mxu0 %v4028_v20  ;;  %3626 = vmatprep.subr.bf16.mxu1 %v5153_v1 }
  0xd0   :  { %470 = vmatprep.subr.bf16.mxu0 %v4029_v21 }
  0xd2   :  { %3627 = vmatpush3.bf16.msra.mxu1 %v4040_v40 }
  0xd3   :  { %471 = vmatpush1.bf16.msra.mxu0 %v4031_v28  ;;  %3628 = vmatprep.subr.bf16.mxu1 %v5153_v1 }
  0xd4   :  { %472 = vmatprep.subr.bf16.mxu0 %v4032_v32 }
  0xd6   :  { %965 = vxpose.xlu0.c.b16.start.end [1/1] (short) %v3344_v39, 128  ;;  %3629 = vmatpush3.bf16.msra.mxu1 %v4041_v43 }
  0xd7   :  { %473 = vmatpush1.bf16.msra.mxu0 %v4034_v36  ;;  %3630 = vmatprep.subr.bf16.mxu1 %v5153_v1  ;;  %v4722_v36 = vld [vmem:[%s5173_s13] ss:$0 sm:$0xff] }
  0xd8   :  { %3636 = vmatprep.subr.bf16.mxu0 %v634_v41 }
  0xda   :  { %491 = vmatmul.mubr.bf16.vlgmr.msra.gmra.mxu0 %v280_v42  ;;  %3631 = vmatpush3.bf16.msra.mxu1 %v4042_v44 }
  0xdb   :  { %3637 = vmatpush3.bf16.msra.mxu0 %v634_v41  ;;  %3654 = vmatprep.subr.bf16.mxu1 %v4043_v49 }
  0xdd   :  { %3633 = vmatmul.mubr.bf16.vlgmr.msra.gmra.mxu1 %v280_v42 }
  0xde   :  { %3655 = vmatpush3.bf16.msra.mxu1 %v4043_v49 }
  0xdf   :  { %3656 = vmatprep.subr.bf16.mxu1 %v4044_v50 }
  0xe2   :  { %3657 = vmatpush3.bf16.msra.mxu1 %v4044_v50 }
  0xe3   :  { %3658 = vmatprep.subr.bf16.mxu1 %v4045_v52 }
  0xe6   :  { %3659 = vmatpush3.bf16.msra.mxu1 %v4045_v52 }
  0xe7   :  { %3660 = vmatprep.subr.bf16.mxu1 %v4046_v54 }
  0xea   :  { %3661 = vmatpush3.bf16.msra.mxu1 %v4046_v54 }
  0xeb   :  { %3662 = vmatprep.subr.bf16.mxu1 %v4047_v56 }
  0xee   :  { %3663 = vmatpush3.bf16.msra.mxu1 %v4047_v56 }
  0xef   :  { %3664 = vmatprep.subr.bf16.mxu1 %v4048_v58 }
  0xf2   :  { %3665 = vmatpush3.bf16.msra.mxu1 %v4048_v58 }
  0xf3   :  { %3666 = vmatprep.subr.bf16.mxu1 %v4049_v59 }
  0xf6   :  { %3667 = vmatpush3.bf16.msra.mxu1 %v4049_v59 }
  0xf7   :  { %3668 = vmatprep.subr.bf16.mxu1 %v4050_v60 }
  0xfa   :  { %3669 = vmatpush3.bf16.msra.mxu1 %v4050_v60 }
 0x11b   :  { %v596_v45 = vpop.trf.xlu0 }
 0x11c   :  { %3638 = vmatprep.mubr.msk.bf16.mxu0 %vm604_vm3, %v596_v45 }
 0x11f   :  { %v597_v46 = vpop.trf.xlu0 }
 0x120   :  { %3639 = vmatmul.mubr.msk.bf16.vlgmr.msra.gmra.mxu0 %vm604_vm3, %v597_v46 }
 0x123   :  { %v598_v47 = vpop.trf.xlu0 }
 0x124   :  { %3642 = vmatprep.mubr.msk.bf16.mxu0 %vm604_vm3, %v598_v47 }
 0x127   :  { %v599_v48 = vpop.trf.xlu0 }
 0x128   :  { %3643 = vmatmul.mubr.msk.bf16.gmra.mxu0 %vm604_vm3, %v599_v48 }
 0x12b   :  { %v600_v51 = vpop.trf.xlu0 }
 0x12c   :  { %3646 = vmatprep.mubr.msk.bf16.mxu0 %vm604_vm3, %v600_v51 }
 0x12f   :  { %v601_v53 = vpop.trf.xlu0 }
 0x130   :  { %3647 = vmatmul.mubr.msk.bf16.gmra.mxu0 %vm604_vm3, %v601_v53 }
 0x133   :  { %v602_v55 = vpop.trf.xlu0 }
 0x134   :  { %3650 = vmatprep.mubr.msk.bf16.mxu0 %vm604_vm3, %v602_v55 }
 0x137   :  { %v603_v57 = vpop.trf.xlu0 }
 0x138   :  { %3651 = vmatmul.mubr.msk.bf16.gmra.mxu0 %vm604_vm3, %v603_v57 }
 0x139   :  { %1048 = vmatprep.mubr.bf16.mxu0 %v4467_v0 }
 0x13b   :  { %v973_v22 = vpop.trf.xlu0 }
 0x13f   :  { %v974_v27 = vpop.trf.xlu0 }
 0x143   :  { %v975_v29 = vpop.trf.xlu0 }
 0x147   :  { %v976_v30 = vpop.trf.xlu0 }
 0x14b   :  { %v977_v31 = vpop.trf.xlu0 }
 0x14f   :  { %v978_v32 = vpop.trf.xlu0 }
 0x153   :  { %v979_v33 = vpop.trf.xlu0 }
 0x157   :  { %v980_v37 = vpop.trf.xlu0 }
 0x19a   :  { %v492_v6 = vpop.f32.mrf.mxu0 }
 0x19b   :  { %v493_v7 = vadd.f32 %v492_v6, %v318_v4 }
 0x19c   :  { %v494_v8 = vpop.f32.mrf.mxu0 }
 0x19d   :  { %v495_v9 = vadd.f32 %v494_v8, %v322_v5  ;;  %v535_v16 = vpop.f32.mrf.mxu1 }
 0x19e   :  { %v496_v11 = vpop.f32.mrf.mxu0  ;;  %v536_v19 = vadd.f32 %v535_v16, %v326_v15 }
 0x19f   :  { %v497_v12 = vadd.f32 %v496_v11, %v318_v4  ;;  %v3634_v20 = vpop.f32.mrf.mxu1 }
 0x1a0   :  { %v498_v13 = vpop.f32.mrf.mxu0  ;;  %v3451_v21 = vpack.c.bf16 %v536_v19, %v536_v19 }
 0x1a1   :  { %v499_v14 = vadd.f32 %v498_v13, %v322_v5  ;;  %v4163_v17 = vpack.c.bf16 %v497_v12, %v493_v7  ;;  %v538_v23 = vpop.f32.mrf.mxu1 }
 0x1a2   :  { %563 = vst [vmem:[#allocation2 + $0x8] sm:$0xf] %v3451_v21  ;;  %v539_v24 = vadd.f32 %v538_v23, %v326_v15 }
 0x1a3   :  { %v4164_v18 = vpack.c.bf16 %v499_v14, %v495_v9  ;;  %v3635_v25 = vpop.f32.mrf.mxu1 }
 0x1a4   :  { %v3453_v26 = vpack.c.bf16 %v539_v24, %v539_v24  ;;  %v1145_v25 = vpop.trf.xlu1 }
 0x1a5   :  { %1030 = vmatprep.subr.bf16.mxu0 %v4164_v18  ;;  %v4052_v18 = vld [vmem:[%s5174_s17 + $0x38] sm:$0xff]  }
 0x1a6   :  { %1031 = vmatpush1.bf16.msra.mxu0 %v4163_v17  ;;  %565 = vst [vmem:[#allocation2 + $0x14] sm:$0xf] %v3453_v26 }
 0x1a7   :  { %3736 = vmatprep.subr.bf16.mxu0 %v4052_v18 }
 0x1a9   :  { %3347 = vmatmul.mubr.msk.bf16.vlgmr.msra.gmra.mxu0 %vm991_vm4, %v973_v22 }
 0x1aa   :  { %1058 = vmatprep.mubr.bf16.mxu0 %v4467_v0  ;;  %3737 = vmatpush3.bf16.msra.mxu0 %v4052_v18 }
 0x1ad   :  { %v4051_v28 = vld [vmem:[#allocation2 + $0x8] ss:$12 sps:$4 sm:$0xff]  }
 0x1ae   :  { %3686 = vmatprep.subr.bf16.mxu1 %v4051_v28 }
 0x1b1   :  { %3348 = vmatmul.mubr.msk.bf16.gmra.mxu0 %vm991_vm4, %v974_v27 }
 0x1b2   :  { %1068 = vmatprep.mubr.bf16.mxu0 %v4467_v0 }
 0x1b9   :  { %3349 = vmatmul.mubr.msk.bf16.gmra.mxu0 %vm991_vm4, %v975_v29 }
 0x1ba   :  { %1078 = vmatprep.mubr.bf16.mxu0 %v4467_v0 }
 0x1c1   :  { %3350 = vmatmul.mubr.msk.bf16.gmra.mxu0 %vm991_vm4, %v976_v30 }
 0x1c2   :  { %1088 = vmatprep.mubr.bf16.mxu0 %v4467_v0 }
 0x1c9   :  { %3351 = vmatmul.mubr.msk.bf16.gmra.mxu0 %vm991_vm4, %v977_v31 }
 0x1ca   :  { %1098 = vmatprep.mubr.bf16.mxu0 %v4467_v0 }
 0x1d1   :  { %3352 = vmatmul.mubr.msk.bf16.gmra.mxu0 %vm991_vm4, %v978_v32 }
 0x1d2   :  { %1108 = vmatprep.mubr.bf16.mxu0 %v4467_v0 }
 0x1d9   :  { %3353 = vmatmul.mubr.msk.bf16.gmra.mxu0 %vm991_vm4, %v979_v33 }
 0x1da   :  { %1118 = vmatprep.mubr.bf16.mxu0 %v4467_v0 }
 0x1e0   :  { %v3640_v34 = vpop.f32.mrf.mxu0 }
 0x1e1   :  { %v679_v40 = vadd.f32 %v3640_v34, %v4722_v36  ;;  %3354 = vmatmul.mubr.msk.bf16.gmra.mxu0 %vm991_vm4, %v980_v37 }
 0x1e2   :  { %v670_v38 = vpop.f32.mrf.mxu0 }
 0x1e3   :  { %v671_v39 = vadd.f32 %v4722_v36, %v670_v38  ;;  %v751_v46 = vmul.f32 0.01, %v679_v40  ;;  %vm735_vm7 = vcmp.ge.f32.partialorder %v679_v40, 0.0 }
 0x1e4   :  { %v3641_v41 = vpop.f32.mrf.mxu0 }
 0x1e5   :  { %v682_v42 = vadd.f32 %v3641_v41, %v4722_v36  ;;  %v749_v44 = vmul.f32 0.01, %v671_v39  ;;  %vm733_vm6 = vcmp.ge.f32.partialorder %v671_v39, 0.0  ;;  %v767_v54 = vsel %vm735_vm7, %v679_v40, %v751_v46  ;;  %v4053_v40 = vld [vmem:[%s5174_s17 + $0x30] sm:$0xff]  }
 0x1e6   :  { %v673_v43 = vpop.f32.mrf.mxu0  ;;  %3738 = vmatprep.subr.bf16.mxu0 %v4053_v40 }
 0x1e7   :  { %vm736_vm5 = vcmp.ge.f32.partialorder %v682_v42, 0.0  ;;  %v752_v45 = vmul.f32 0.01, %v682_v42  ;;  %v674_v0 = vadd.f32 %v4722_v36, %v673_v43  ;;  %v765_v52 = vsel %vm733_vm6, %v671_v39, %v749_v44  ;;  %v1146_v44 = vpop.trf.xlu1  ;;  %3739 = vmatpush3.bf16.msra.mxu0 %v4053_v40 }
 0x1e8   :  { %v3644_v47 = vpop.f32.mrf.mxu0 }
 0x1e9   :  { %vm734_vm8 = vcmp.ge.f32.partialorder %v674_v0, 0.0  ;;  %v750_v48 = vmul.f32 0.01, %v674_v0  ;;  %v768_v49 = vsel %vm736_vm5, %v682_v42, %v752_v45  ;;  %v695_v55 = vadd.f32 %v3644_v47, %v4722_v36 }
 0x1ea   :  { %v686_v50 = vpop.f32.mrf.mxu0  ;;  %v782_v58 = vpack.c.bf16 %v768_v49, %v767_v54 }
 0x1eb   :  { %v687_v51 = vadd.f32 %v4722_v36, %v686_v50  ;;  %v766_v53 = vsel %vm734_vm8, %v674_v0, %v750_v48  ;;  %v755_v3 = vmul.f32 0.01, %v695_v55  ;;  %vm739_vm11 = vcmp.ge.f32.partialorder %v695_v55, 0.0 }
 0x1ec   :  { %v3645_v56 = vpop.f32.mrf.mxu0  ;;  %v781_v57 = vpack.c.bf16 %v766_v53, %v765_v52  ;;  %v1147_v52 = vpop.trf.xlu1  ;;  %v4054_v53 = vld [vmem:[%s5174_s17 + $0x28] sm:$0xff]   ;;  %vm1488_vm8 = vcmask 31744  }
 0x1ed   :  { %v698_v59 = vadd.f32 %v3645_v56, %v4722_v36  ;;  %v753_v61 = vmul.f32 0.01, %v687_v51  ;;  %vm737_vm10 = vcmp.ge.f32.partialorder %v687_v51, 0.0  ;;  %v771_v14 = vsel %vm739_vm11, %v695_v55, %v755_v3  ;;  %3740 = vmatprep.subr.bf16.mxu0 %v4054_v53  ;;  %v4061_v3 = vld [vmem:[%s5175_s6 + $0x20] sm:$0xff]  }
 0x1ee   :  { %v689_v60 = vpop.f32.mrf.mxu0  ;;  %3670 = vmatprep.mubr.bf16.mxu1 %v781_v57  ;;  %3741 = vmatpush3.bf16.msra.mxu0 %v4054_v53 }
 0x1ef   :  { %vm740_vm9 = vcmp.ge.f32.partialorder %v698_v59, 0.0  ;;  %v756_v62 = vmul.f32 0.01, %v698_v59  ;;  %v690_v2 = vadd.f32 %v4722_v36, %v689_v60  ;;  %3671 = vmatmul.mubr.bf16.vlgmr.msra.gmra.mxu1 %v782_v58  ;;  %v769_v9 = vsel %vm737_vm10, %v687_v51, %v753_v61  ;;  %v4055_v58 = vld [vmem:[%s5174_s17 + $0x20] sm:$0xff]   ;;  %v4057_v60 = vld [vmem:[%s5174_s17 + $0x18] sm:$0xff]   ;;  %v4058_v61 = vld [vmem:[%s5175_s6 + $0x30] sm:$0xff]  }
 0x1f0   :  { %3687 = vmatpush3.bf16.msra.mxu1 %v4051_v28  ;;  %v3648_v4 = vpop.f32.mrf.mxu0  ;;  %3742 = vmatprep.subr.bf16.mxu0 %v4055_v58 }
 0x1f1   :  { %vm738_vm12 = vcmp.ge.f32.partialorder %v690_v2, 0.0  ;;  %v754_v5 = vmul.f32 0.01, %v690_v2  ;;  %v772_v7 = vsel %vm740_vm9, %v698_v59, %v756_v62  ;;  %v711_v11 = vadd.f32 %v3648_v4, %v4722_v36  ;;  %v4056_v59 = vld [vmem:[%s5175_s6 + $0x38] sm:$0xff]   ;;  %v4059_v62 = vld [vmem:[%s5175_s6 + $0x28] sm:$0xff]  }
 0x1f2   :  { %v702_v6 = vpop.f32.mrf.mxu0  ;;  %v784_v16 = vpack.c.bf16 %v772_v7, %v771_v14  ;;  %3743 = vmatpush3.bf16.msra.mxu0 %v4055_v58  ;;  %3704 = vmatprep.subr.bf16.mxu1 %v4056_v59  ;;  %v4062_v4 = vld [vmem:[%s5175_s6 + $0x18] sm:$0xff]   ;;  %v4065_v7 = vld [vmem:[%s5175_s6 + $0x8] sm:$0xff]   ;;  %vm1715_vm9 = vcmask 1040384  }
 0x1f3   :  { %v703_v8 = vadd.f32 %v4722_v36, %v702_v6  ;;  %v770_v10 = vsel %vm738_vm12, %v690_v2, %v754_v5  ;;  %v759_v22 = vmul.f32 0.01, %v711_v11  ;;  %vm743_vm15 = vcmp.ge.f32.partialorder %v711_v11, 0.0  ;;  %3744 = vmatprep.subr.bf16.mxu0 %v4057_v60  ;;  %v4060_v2 = vld [vmem:[%s5174_s17 + $0x10] sm:$0xff]   ;;  %v4063_v5 = vld [vmem:[%s5174_s17 + $0x8] sm:$0xff]  }
 0x1f4   :  { %v3649_v12 = vpop.f32.mrf.mxu0  ;;  %v783_v13 = vpack.c.bf16 %v770_v10, %v769_v9  ;;  %v4064_v6 = vld [vmem:[%s5175_s6 + $0x10] sm:$0xff]   ;;  %v4066_v9 = vld [vmem:[%s5174_s17] sm:$0xff]  }
 0x1f5   :  { %v714_v15 = vadd.f32 %v3649_v12, %v4722_v36  ;;  %v757_v19 = vmul.f32 0.01, %v703_v8  ;;  %vm741_vm14 = vcmp.ge.f32.partialorder %v703_v8, 0.0  ;;  %v775_v34 = vsel %vm743_vm15, %v711_v11, %v759_v22 }
 0x1f6   :  { %v705_v17 = vpop.f32.mrf.mxu0  ;;  %3674 = vmatprep.mubr.bf16.mxu1 %v783_v13  ;;  %3745 = vmatpush3.bf16.msra.mxu0 %v4057_v60 }
 0x1f7   :  { %vm744_vm13 = vcmp.ge.f32.partialorder %v714_v15, 0.0  ;;  %v760_v20 = vmul.f32 0.01, %v714_v15  ;;  %v706_v21 = vadd.f32 %v4722_v36, %v705_v17  ;;  %3675 = vmatmul.mubr.bf16.gmra.mxu1 %v784_v16  ;;  %v773_v29 = vsel %vm741_vm14, %v703_v8, %v757_v19  ;;  %3746 = vmatprep.subr.bf16.mxu0 %v4060_v2  ;;  %v4067_v8 = vld [vmem:[%s5175_s6] sm:$0xff]  }
 0x1f8   :  { %v3652_v23 = vpop.f32.mrf.mxu0 }
 0x1f9   :  { %vm742_vm2 = vcmp.ge.f32.partialorder %v706_v21, 0.0  ;;  %v758_v24 = vmul.f32 0.01, %v706_v21  ;;  %v776_v27 = vsel %vm744_vm13, %v714_v15, %v760_v20  ;;  %v727_v31 = vadd.f32 %v3652_v23, %v4722_v36 }
 0x1fa   :  { %v718_v26 = vpop.f32.mrf.mxu0  ;;  %v786_v38 = vpack.c.bf16 %v776_v27, %v775_v34  ;;  %3747 = vmatpush3.bf16.msra.mxu0 %v4060_v2 }
 0x1fb   :  { %v719_v28 = vadd.f32 %v4722_v36, %v718_v26  ;;  %v774_v30 = vsel %vm742_vm2, %v706_v21, %v758_v24  ;;  %v763_v45 = vmul.f32 0.01, %v727_v31  ;;  %vm747_vm6 = vcmp.ge.f32.partialorder %v727_v31, 0.0  ;;  %3748 = vmatprep.subr.bf16.mxu0 %v4063_v5 }
 0x1fc   :  { %v3653_v32 = vpop.f32.mrf.mxu0  ;;  %v785_v33 = vpack.c.bf16 %v774_v30, %v773_v29 }
 0x1fd   :  { %v730_v37 = vadd.f32 %v3653_v32, %v4722_v36  ;;  %v761_v41 = vmul.f32 0.01, %v719_v28  ;;  %vm745_vm5 = vcmp.ge.f32.partialorder %v719_v28, 0.0  ;;  %v779_v50 = vsel %vm747_vm6, %v727_v31, %v763_v45 }
 0x1fe   :  { %v721_v39 = vpop.f32.mrf.mxu0  ;;  %3678 = vmatprep.mubr.bf16.mxu1 %v785_v33  ;;  %3749 = vmatpush3.bf16.msra.mxu0 %v4063_v5 }
 0x1ff   :  { %vm748_vm3 = vcmp.ge.f32.partialorder %v730_v37, 0.0  ;;  %v764_v42 = vmul.f32 0.01, %v730_v37  ;;  %v722_v43 = vadd.f32 %v4722_v36, %v721_v39  ;;  %3679 = vmatmul.mubr.bf16.gmra.mxu1 %v786_v38  ;;  %v777_v47 = vsel %vm745_vm5, %v719_v28, %v761_v41  ;;  %v1148_v36 = vpop.trf.xlu1  ;;  %3750 = vmatprep.subr.bf16.mxu0 %v4066_v9 }
 0x201   :  { %vm746_vm7 = vcmp.ge.f32.partialorder %v722_v43, 0.0  ;;  %v762_v0 = vmul.f32 0.01, %v722_v43  ;;  %v780_v46 = vsel %vm748_vm3, %v730_v37, %v764_v42 }
 0x202   :  { %v788_v51 = vpack.c.bf16 %v780_v46, %v779_v50  ;;  %3751 = vmatpush3.bf16.msra.mxu0 %v4066_v9 }
 0x203   :  { %v778_v48 = vsel %vm746_vm7, %v722_v43, %v762_v0  ;;  %v1149_v54 = vpop.trf.xlu1 }
 0x204   :  { %v787_v49 = vpack.c.bf16 %v778_v48, %v777_v47 }
 0x206   :  { %3682 = vmatprep.mubr.bf16.mxu1 %v787_v49 }
 0x207   :  { %3683 = vmatmul.mubr.bf16.gmra.mxu1 %v788_v51  ;;  %v1150_v55 = vpop.trf.xlu1 }
 0x208   :  { %3688 = vmatprep.mubr.msk.bf16.mxu1 %vm991_vm4, %v1145_v25 }
 0x20b   :  { %v1151_v56 = vpop.trf.xlu1 }
 0x20f   :  { %3689 = vmatmul.mubr.msk.bf16.vlgmr.msra.gmra.mxu1 %vm991_vm4, %v1146_v44  ;;  %v1152_v57 = vpop.trf.xlu1 }
 0x210   :  { %3692 = vmatprep.mubr.msk.bf16.mxu1 %vm991_vm4, %v1147_v52  ;;  %3705 = vmatpush3.bf16.msra.mxu1 %v4056_v59 }
 0x211   :  { %3706 = vmatprep.subr.bf16.mxu1 %v4058_v61 }
 0x214   :  { %3707 = vmatpush3.bf16.msra.mxu1 %v4058_v61 }
 0x215   :  { %3708 = vmatprep.subr.bf16.mxu1 %v4059_v62 }
 0x217   :  { %3693 = vmatmul.mubr.msk.bf16.gmra.mxu1 %vm991_vm4, %v1148_v36 }
 0x218   :  { %3696 = vmatprep.mubr.msk.bf16.mxu1 %vm991_vm4, %v1149_v54  ;;  %3709 = vmatpush3.bf16.msra.mxu1 %v4059_v62 }
 0x219   :  { %3710 = vmatprep.subr.bf16.mxu1 %v4061_v3 }
 0x21c   :  { %3711 = vmatpush3.bf16.msra.mxu1 %v4061_v3 }
 0x21d   :  { %3712 = vmatprep.subr.bf16.mxu1 %v4062_v4 }
 0x21f   :  { %3697 = vmatmul.mubr.msk.bf16.gmra.mxu1 %vm991_vm4, %v1150_v55 }
 0x220   :  { %3700 = vmatprep.mubr.msk.bf16.mxu1 %vm991_vm4, %v1151_v56  ;;  %3713 = vmatpush3.bf16.msra.mxu1 %v4062_v4 }
 0x221   :  { %3714 = vmatprep.subr.bf16.mxu1 %v4064_v6 }
 0x224   :  { %3715 = vmatpush3.bf16.msra.mxu1 %v4064_v6 }
 0x225   :  { %3716 = vmatprep.subr.bf16.mxu1 %v4065_v7 }
 0x227   :  { %3701 = vmatmul.mubr.msk.bf16.gmra.mxu1 %vm991_vm4, %v1152_v57  ;;  %v4828_v57 = vld [vmem:[%s5180_s12] ss:$0 sm:$0xff] }
 0x228   :  { %3717 = vmatpush3.bf16.msra.mxu1 %v4065_v7 }
 0x229   :  { %3718 = vmatprep.subr.bf16.mxu1 %v4067_v8 }
 0x22c   :  { %3719 = vmatpush3.bf16.msra.mxu1 %v4067_v8 }
 0x269   :  { %v1050_v10 = vpop.f32.mrf.mxu0 }
 0x26b   :  { %v4765_v11 = vpop.f32.mrf.mxu0 }
 0x26c   :  { %5176 = vst [vmem:[#allocation47_spill] sm:$0xff] %v4765_v11 }
 0x26d   :  { %v1054_v12 = vpop.f32.mrf.mxu0 }
 0x26f   :  { %v4767_v13 = vpop.f32.mrf.mxu0 }
 0x270   :  { %5177 = vst [vmem:[#allocation48_spill] sm:$0xff] %v4767_v13 }
 0x271   :  { %v1060_v14 = vpop.f32.mrf.mxu0 }
 0x273   :  { %v4769_v15 = vpop.f32.mrf.mxu0 }
 0x274   :  { %5178 = vst [vmem:[#allocation49_spill] sm:$0xff] %v4769_v15 }
 0x275   :  { %v1064_v16 = vpop.f32.mrf.mxu0 }
 0x277   :  { %v4771_v17 = vpop.f32.mrf.mxu0 }
 0x278   :  { %5179 = vst [vmem:[#allocation50_spill] sm:$0xff] %v4771_v17 }
 0x279   :  { %v4773_v18 = vpop.f32.mrf.mxu0 }
 0x27b   :  { %v4775_v19 = vpop.f32.mrf.mxu0 }
 0x27d   :  { %v4777_v20 = vpop.f32.mrf.mxu0 }
 0x27f   :  { %v4779_v21 = vpop.f32.mrf.mxu0 }
 0x281   :  { %v4781_v22 = vpop.f32.mrf.mxu0 }
 0x283   :  { %v4783_v23 = vpop.f32.mrf.mxu0 }
 0x285   :  { %v4785_v24 = vpop.f32.mrf.mxu0 }
 0x287   :  { %v4787_v25 = vpop.f32.mrf.mxu0 }
 0x289   :  { %v4789_v26 = vpop.f32.mrf.mxu0 }
 0x28b   :  { %v4791_v27 = vpop.f32.mrf.mxu0 }
 0x28d   :  { %v4793_v28 = vpop.f32.mrf.mxu0 }
 0x28f   :  { %v4795_v29 = vpop.f32.mrf.mxu0 }
 0x291   :  { %v4797_v30 = vpop.f32.mrf.mxu0 }
 0x293   :  { %v4799_v31 = vpop.f32.mrf.mxu0 }
 0x295   :  { %v4801_v32 = vpop.f32.mrf.mxu0 }
 0x297   :  { %v4803_v33 = vpop.f32.mrf.mxu0 }
 0x299   :  { %v4805_v34 = vpop.f32.mrf.mxu0 }
 0x29b   :  { %v4807_v37 = vpop.f32.mrf.mxu0 }
 0x29d   :  { %v4809_v38 = vpop.f32.mrf.mxu0 }
 0x29f   :  { %v4811_v39 = vpop.f32.mrf.mxu0 }
 0x2a1   :  { %v4813_v40 = vpop.f32.mrf.mxu0 }
 0x2a3   :  { %v4815_v41 = vpop.f32.mrf.mxu0 }
 0x2a5   :  { %v4817_v42 = vpop.f32.mrf.mxu0 }
 0x2a7   :  { %v4819_v43 = vpop.f32.mrf.mxu0 }
 0x2af   :  { %v3672_v44 = vpop.f32.mrf.mxu1 }
 0x2b0   :  { %v903_v61 = vadd.f32 %v3672_v44, %v4828_v57 }
 0x2b1   :  { %v894_v45 = vpop.f32.mrf.mxu1 }
 0x2b2   :  { %v895_v59 = vadd.f32 %v4828_v57, %v894_v45  ;;  %v1282_v6 = vmul.f32 %v1060_v14, %v903_v61 }
 0x2b3   :  { %v3673_v0 = vpop.f32.mrf.mxu1 }
 0x2b4   :  { %v906_v60 = vadd.f32 %v3673_v0, %v4828_v57  ;;  %v1280_v4 = vmul.f32 %v1050_v10, %v895_v59 }
 0x2b5   :  { %v897_v46 = vpop.f32.mrf.mxu1 }
 0x2b6   :  { %v898_v2 = vadd.f32 %v4828_v57, %v897_v46  ;;  %v1283_v5 = vmul.f32 %v1064_v16, %v906_v60 }
 0x2b7   :  { %v3676_v47 = vpop.f32.mrf.mxu1 }
 0x2b8   :  { %v1281_v1 = vmul.f32 %v1054_v12, %v898_v2  ;;  %v919_v44 = vadd.f32 %v3676_v47, %v4828_v57 }
 0x2b9   :  { %v910_v48 = vpop.f32.mrf.mxu1 }
 0x2ba   :  { %v911_v11 = vadd.f32 %v4828_v57, %v910_v48 }
 0x2bb   :  { %v3677_v49 = vpop.f32.mrf.mxu1 }
 0x2bc   :  { %v922_v45 = vadd.f32 %v3677_v49, %v4828_v57  ;;  %v1284_v12 = vmul.f32 %v4773_v18, %v911_v11 }
 0x2bd   :  { %v913_v50 = vpop.f32.mrf.mxu1 }
 0x2be   :  { %v914_v46 = vadd.f32 %v4828_v57, %v913_v50  ;;  %v1287_v48 = vmul.f32 %v4785_v24, %v922_v45 }
 0x2bf   :  { %v3680_v51 = vpop.f32.mrf.mxu1 }
 0x2c0   :  { %v1285_v50 = vmul.f32 %v4777_v20, %v914_v46  ;;  %v935_v24 = vadd.f32 %v3680_v51, %v4828_v57 }
 0x2c1   :  { %v926_v52 = vpop.f32.mrf.mxu1 }
 0x2c3   :  { %v3681_v53 = vpop.f32.mrf.mxu1 }
 0x2c4   :  { %v938_v11 = vadd.f32 %v3681_v53, %v4828_v57  ;;  %v1290_v53 = vmul.f32 %v4797_v30, %v935_v24 }
 0x2c5   :  { %v929_v36 = vpop.f32.mrf.mxu1 }
 0x2c7   :  { %v4821_v54 = vpop.f32.mrf.mxu1 }
 0x2c8   :  { %v951_v30 = vadd.f32 %v4821_v54, %v4828_v57 }
 0x2c9   :  { %v4823_v55 = vpop.f32.mrf.mxu1 }
 0x2cb   :  { %v4825_v56 = vpop.f32.mrf.mxu1 }
 0x2cd   :  { %v4830_v58 = vpop.f32.mrf.mxu1 }
 0x2cf   :  { %v3690_v62 = vpop.f32.mrf.mxu1 }
 0x2d0   :  { %v1298_v35 = vmul.f32 %v3690_v62, %v1282_v6 }
 0x2d1   :  { %v1217_v3 = vpop.f32.mrf.mxu1 }
 0x2d2   :  { %v1296_v8 = vmul.f32 %v1280_v4, %v1217_v3  ;;  %v1507_v59 = vand.u32 2147483647, %v1298_v35 }
 0x2d3   :  { %v3691_v7 = vpop.f32.mrf.mxu1 }
 0x2d4   :  { %v1299_v9 = vmul.f32 %v3691_v7, %v1283_v5  ;;  %v1505_v10 = vand.u32 2147483647, %v1296_v8 }
 0x2d5   :  { %v1220_v13 = vpop.f32.mrf.mxu1 }
 0x2d6   :  { %v1297_v0 = vmul.f32 %v1281_v1, %v1220_v13  ;;  %v1508_v17 = vand.u32 2147483647, %v1299_v9  ;;  %v1313_v60 = vpack.c.bf16 %v1299_v9, %v1298_v35  ;;  %v1286_v1 = vmul.f32 %v4781_v22, %v919_v44 }
 0x2d7   :  { %v3694_v15 = vpop.f32.mrf.mxu1  ;;  %v927_v35 = vadd.f32 %v4828_v57, %v926_v52  ;;  %v930_v22 = vadd.f32 %v4828_v57, %v929_v36  ;;  %v1291_v52 = vmul.f32 %v4801_v32, %v938_v11  ;;  %v954_v32 = vadd.f32 %v4825_v56, %v4828_v57 }
 0x2d8   :  { %v1312_v16 = vpack.c.bf16 %v1297_v0, %v1296_v8  ;;  %v1506_v14 = vand.u32 2147483647, %v1297_v0  ;;  %v1522_v49 = vpack.c.bf16 %v1508_v17, %v1507_v59  ;;  %v1302_v3 = vmul.f32 %v3694_v15, %v1286_v1 }
 0x2d9   :  { %v1233_v61 = vpop.f32.mrf.mxu1  ;;  %v1288_v15 = vmul.f32 %v4789_v26, %v927_v35  ;;  %v1289_v36 = vmul.f32 %v4793_v28, %v930_v22  ;;  %v943_v26 = vadd.f32 %v4828_v57, %v4823_v55  ;;  %v1295_v55 = vmul.f32 %v4817_v42, %v954_v32 }
 0x2da   :  { %3720 = vmatprep.mubr.bf16.mxu1 %v1312_v16  ;;  %v1521_v62 = vpack.c.bf16 %v1506_v14, %v1505_v10  ;;  %v1300_v47 = vmul.f32 %v1284_v12, %v1233_v61  ;;  %v1511_v9 = vand.u32 2147483647, %v1302_v3  ;;  %v946_v12 = vadd.f32 %v4828_v57, %v4830_v58 }
 0x2db   :  { %v3695_v13 = vpop.f32.mrf.mxu1  ;;  %3721 = vmatmul.mubr.bf16.vlgmr.msra.gmra.mxu1 %v1313_v60 }
 0x2dc   :  { %v1303_v2 = vmul.f32 %v3695_v13, %v1287_v48  ;;  %3752 = vmatprep.mubr.bf16.mxu0 %v1521_v62  ;;  %v1509_v6 = vand.u32 2147483647, %v1300_v47  ;;  %v1293_v57 = vmul.f32 %v4809_v38, %v946_v12  ;;  %v4865_v38 = vld [vmem:[%s5181_s20] ss:$0 sm:$0xff] }
 0x2dd   :  { %v1236_v4 = vpop.f32.mrf.mxu1  ;;  %3753 = vmatmul.mubr.bf16.vlgmr.msra.gmra.mxu0 %v1522_v49 }
 0x2de   :  { %v1301_v18 = vmul.f32 %v1285_v50, %v1236_v4  ;;  %v1512_v17 = vand.u32 2147483647, %v1303_v2  ;;  %v1315_v45 = vpack.c.bf16 %v1303_v2, %v1302_v3  ;;  %v1294_v2 = vmul.f32 %v4813_v40, %v951_v30 }
 0x2df   :  { %v3698_v5 = vpop.f32.mrf.mxu1 }
 0x2e0   :  { %v1314_v7 = vpack.c.bf16 %v1301_v18, %v1300_v47  ;;  %v1510_v8 = vand.u32 2147483647, %v1301_v18  ;;  %v1524_v51 = vpack.c.bf16 %v1512_v17, %v1511_v9  ;;  %v1306_v16 = vmul.f32 %v3698_v5, %v1290_v53 }
 0x2e1   :  { %v1249_v20 = vpop.f32.mrf.mxu1  ;;  %v1292_v47 = vmul.f32 %v4805_v34, %v943_v26 }
 0x2e2   :  { %3724 = vmatprep.mubr.bf16.mxu1 %v1314_v7  ;;  %v1523_v0 = vpack.c.bf16 %v1510_v8, %v1509_v6  ;;  %v1304_v46 = vmul.f32 %v1288_v15, %v1249_v20  ;;  %v1515_v49 = vand.u32 2147483647, %v1306_v16 }
 0x2e3   :  { %v3699_v44 = vpop.f32.mrf.mxu1  ;;  %3725 = vmatmul.mubr.bf16.gmra.mxu1 %v1315_v45 }
 0x2e4   :  { %v1307_v10 = vmul.f32 %v3699_v44, %v1291_v52  ;;  %3756 = vmatprep.mubr.bf16.mxu0 %v1523_v0  ;;  %v1513_v48 = vand.u32 2147483647, %v1304_v46 }
 0x2e5   :  { %v1252_v14 = vpop.f32.mrf.mxu1  ;;  %3757 = vmatmul.mubr.bf16.gmra.mxu0 %v1524_v51 }
 0x2e6   :  { %v1305_v59 = vmul.f32 %v1289_v36, %v1252_v14  ;;  %v1516_v60 = vand.u32 2147483647, %v1307_v10  ;;  %v1317_v1 = vpack.c.bf16 %v1307_v10, %v1306_v16 }
 0x2e7   :  { %v3702_v61 = vpop.f32.mrf.mxu1 }
 0x2e8   :  { %v1316_v28 = vpack.c.bf16 %v1305_v59, %v1304_v46  ;;  %v1514_v62 = vand.u32 2147483647, %v1305_v59  ;;  %v1526_v50 = vpack.c.bf16 %v1516_v60, %v1515_v49  ;;  %v1310_v58 = vmul.f32 %v3702_v61, %v1294_v2 }
 0x2e9   :  { %v1265_v13 = vpop.f32.mrf.mxu1 }
 0x2ea   :  { %3728 = vmatprep.mubr.bf16.mxu1 %v1316_v28  ;;  %v1525_v56 = vpack.c.bf16 %v1514_v62, %v1513_v48  ;;  %v1308_v3 = vmul.f32 %v1292_v47, %v1265_v13  ;;  %v1519_v17 = vand.u32 2147483647, %v1310_v58 }
 0x2eb   :  { %v3703_v54 = vpop.f32.mrf.mxu1  ;;  %3729 = vmatmul.mubr.bf16.gmra.mxu1 %v1317_v1 }
 0x2ec   :  { %v1311_v4 = vmul.f32 %v3703_v54, %v1295_v55  ;;  %3760 = vmatprep.mubr.bf16.mxu0 %v1525_v56  ;;  %v1517_v18 = vand.u32 2147483647, %v1308_v3 }
 0x2ed   :  { %v1268_v35 = vpop.f32.mrf.mxu1  ;;  %3761 = vmatmul.mubr.bf16.gmra.mxu0 %v1526_v50 }
 0x2ee   :  { %v1309_v11 = vmul.f32 %v1293_v57, %v1268_v35  ;;  %v1520_v42 = vand.u32 2147483647, %v1311_v4  ;;  %v1319_v40 = vpack.c.bf16 %v1311_v4, %v1310_v58 }
 0x2f0   :  { %v1318_v34 = vpack.c.bf16 %v1309_v11, %v1308_v3  ;;  %v1518_v24 = vand.u32 2147483647, %v1309_v11  ;;  %v1528_v22 = vpack.c.bf16 %v1520_v42, %v1519_v17 }
 0x2f2   :  { %3732 = vmatprep.mubr.bf16.mxu1 %v1318_v34  ;;  %v1527_v5 = vpack.c.bf16 %v1518_v24, %v1517_v18 }
 0x2f3   :  { %3733 = vmatmul.mubr.bf16.gmra.mxu1 %v1319_v40 }
 0x2f4   :  { %3764 = vmatprep.mubr.bf16.mxu0 %v1527_v5 }
 0x2f5   :  { %3765 = vmatmul.mubr.bf16.gmra.mxu0 %v1528_v22 }
 0x39b   :  { %v3722_v6 = vpop.f32.mrf.mxu1 }
 0x39c   :  { %v1434_v7 = vadd.f32 %v3722_v6, %v4865_v38 }
 0x39d   :  { %v1425_v8 = vpop.f32.mrf.mxu1  ;;  %v4868_v9 = vpop.f32.mrf.mxu0 }
 0x39e   :  { %1491 = vst.msk [vmem:[%s4635_s19 + $0x10] sm:$0xff] %vm1488_vm8, %v1434_v7  ;;  %v1426_v45 = vadd.f32 %v4865_v38, %v1425_v8 }
 0x39f   :  { %v3723_v20 = vpop.f32.mrf.mxu1  ;;  %v4873_v15 = vpop.f32.mrf.mxu0 }
 0x3a0   :  { %1489 = vst.msk [vmem:[%s4635_s19] sm:$0xff] %vm1488_vm8, %v1426_v45  ;;  %v1437_v52 = vadd.f32 %v3723_v20, %v4865_v38 }
 0x3a1   :  { %v1428_v0 = vpop.f32.mrf.mxu1  ;;  %v4878_v53 = vpop.f32.mrf.mxu0 }
 0x3a2   :  { %1492 = vst.msk [vmem:[%s4635_s19 + $0x18] sm:$0xff] %vm1488_vm8, %v1437_v52  ;;  %v1429_v44 = vadd.f32 %v4865_v38, %v1428_v0 }
 0x3a3   :  { %v3726_v51 = vpop.f32.mrf.mxu1  ;;  %v4883_v46 = vpop.f32.mrf.mxu0 }
 0x3a4   :  { %1490 = vst.msk [vmem:[%s4635_s19 + $0x8] sm:$0xff] %vm1488_vm8, %v1429_v44  ;;  %v1450_v10 = vadd.f32 %v3726_v51, %v4865_v38 }
 0x3a5   :  { %v1441_v36 = vpop.f32.mrf.mxu1  ;;  %v4888_v16 = vpop.f32.mrf.mxu0 }
 0x3a6   :  { %1495 = vst.msk [vmem:[%s4635_s19 + $0x30] sm:$0xff] %vm1488_vm8, %v1450_v10  ;;  %v1442_v14 = vadd.f32 %v4865_v38, %v1441_v36  ;;  %v1693_v42 = vmax.f32 %v4868_v9, %v4888_v16 }
 0x3a7   :  { %v3727_v26 = vpop.f32.mrf.mxu1  ;;  %v4893_v32 = vpop.f32.mrf.mxu0 }
 0x3a8   :  { %1493 = vst.msk [vmem:[%s4635_s19 + $0x20] sm:$0xff] %vm1488_vm8, %v1442_v14  ;;  %v1453_v59 = vadd.f32 %v3727_v26, %v4865_v38  ;;  %v1691_v24 = vmax.f32 %v4873_v15, %v4893_v32 }
 0x3a9   :  { %v1444_v30 = vpop.f32.mrf.mxu1  ;;  %v4898_v60 = vpop.f32.mrf.mxu0 }
 0x3aa   :  { %1496 = vst.msk [vmem:[%s4635_s19 + $0x38] sm:$0xff] %vm1488_vm8, %v1453_v59  ;;  %v1445_v61 = vadd.f32 %v4865_v38, %v1444_v30  ;;  %v1694_v35 = vmax.f32 %v4878_v53, %v4898_v60 }
 0x3ab   :  { %v3730_v12 = vpop.f32.mrf.mxu1  ;;  %v4903_v48 = vpop.f32.mrf.mxu0 }
 0x3ac   :  { %1494 = vst.msk [vmem:[%s4635_s19 + $0x28] sm:$0xff] %vm1488_vm8, %v1445_v61  ;;  %v1466_v28 = vadd.f32 %v3730_v12, %v4865_v38  ;;  %v1692_v17 = vmax.f32 %v4883_v46, %v4903_v48 }
 0x3ad   :  { %v1457_v62 = vpop.f32.mrf.mxu1  ;;  %v4908_v49 = vpop.f32.mrf.mxu0 }
 0x3ae   :  { %1499 = vst.msk [vmem:[%s4635_s19 + $0x50] sm:$0xff] %vm1488_vm8, %v1466_v28  ;;  %v1458_v1 = vadd.f32 %v4865_v38, %v1457_v62  ;;  %v1697_v22 = vmax.f32 %v1693_v42, %v4908_v49  ;;  %v1690_v28 = vld [vmem:[#allocation3] sm:$0x1] }
 0x3af   :  { %v3731_v13 = vpop.f32.mrf.mxu1  ;;  %v4913_v55 = vpop.f32.mrf.mxu0 }
 0x3b0   :  { %1497 = vst.msk [vmem:[%s4635_s19 + $0x40] sm:$0xff] %vm1488_vm8, %v1458_v1  ;;  %v1469_v47 = vadd.f32 %v3731_v13, %v4865_v38  ;;  %v1695_v8 = vmax.f32 %v1691_v24, %v4913_v55  ;;  %v4068_v13 = vld [vmem:[#allocation4] sm:$0xff] }
 0x3b1   :  { %v1460_v56 = vpop.f32.mrf.mxu1  ;;  %v4918_v2 = vpop.f32.mrf.mxu0 }
 0x3b2   :  { %1500 = vst.msk [vmem:[%s4635_s19 + $0x58] sm:$0xff] %vm1488_vm8, %v1469_v47  ;;  %v1461_v54 = vadd.f32 %v4865_v38, %v1460_v56  ;;  %v1698_v40 = vmax.f32 %v1694_v35, %v4918_v2 }
 0x3b3   :  { %v3734_v50 = vpop.f32.mrf.mxu1  ;;  %v4923_v3 = vpop.f32.mrf.mxu0 }
 0x3b4   :  { %1498 = vst.msk [vmem:[%s4635_s19 + $0x48] sm:$0xff] %vm1488_vm8, %v1461_v54  ;;  %v1482_v4 = vadd.f32 %v3734_v50, %v4865_v38  ;;  %v1696_v45 = vmax.f32 %v1692_v17, %v4923_v3 }
 0x3b5   :  { %v1473_v57 = vpop.f32.mrf.mxu1  ;;  %v4928_v58 = vpop.f32.mrf.mxu0 }
 0x3b6   :  { %1503 = vst.msk [vmem:[%s4635_s19 + $0x70] sm:$0xff] %vm1488_vm8, %v1482_v4  ;;  %v1474_v11 = vadd.f32 %v4865_v38, %v1473_v57  ;;  %v1701_v44 = vmax.f32 %v1697_v22, %v4928_v58 }
 0x3b7   :  { %v3735_v18 = vpop.f32.mrf.mxu1  ;;  %v4937_v34 = vpop.f32.mrf.mxu0 }
 0x3b8   :  { %1501 = vst.msk [vmem:[%s4635_s19 + $0x60] sm:$0xff] %vm1488_vm8, %v1474_v11  ;;  %v1485_v5 = vadd.f32 %v3735_v18, %v4865_v38  ;;  %v1699_v51 = vmax.f32 %v1695_v8, %v4937_v34 }
 0x3b9   :  { %v1476_v6 = vpop.f32.mrf.mxu1  ;;  %v4948_v7 = vpop.f32.mrf.mxu0 }
 0x3ba   :  { %1504 = vst.msk [vmem:[%s4635_s19 + $0x78] sm:$0xff] %vm1488_vm8, %v1485_v5  ;;  %v1477_v20 = vadd.f32 %v4865_v38, %v1476_v6  ;;  %v1702_v52 = vmax.f32 %v1698_v40, %v4948_v7 }
 0x3bb   :  { %v4956_v0 = vpop.f32.mrf.mxu0 }
 0x3bc   :  { %1502 = vst.msk [vmem:[%s4635_s19 + $0x68] sm:$0xff] %vm1488_vm8, %v1477_v20  ;;  %v1700_v10 = vmax.f32 %v1696_v45, %v4956_v0  ;;  %v1704_v36 = vmax.f32 %v1701_v44, %v1702_v52 }
 0x3be   :  { %v1703_v14 = vmax.f32 %v1699_v51, %v1700_v10 }
 0x3c0   :  { %v1705_v26 = vmax.f32 %v1703_v14, %v1704_v36 }
 0x3c2   :  { %v1706_v59 = vrot.slane %v1705_v26, 4 }
 0x3c4   :  { %v1707_v30 = vmax.f32 %v1705_v26, %v1706_v59 }
 0x3c6   :  { %v1708_v61 = vrot.slane %v1707_v30, 2 }
 0x3c8   :  { %v1709_v12 = vmax.f32 %v1707_v30, %v1708_v61 }
 0x3ca   :  { %v1710_v38 = vrot.slane %v1709_v12, 1 }
 0x3cc   :  { %v1711_v62 = vmax.f32 %v1709_v12, %v1710_v38 }
 0x3ce   :  { %v1712_v1 = vmax.f32 %v1690_v28, %v1711_v62 }
 0x3d0   :  { %vm1713_vm10 = vcmp.gt.f32.partialorder %v1712_v1, %v1690_v28 }
 0x3d1   :  { %v1714_v47 = vsel %vm1713_vm10, 1.0, %v4068_v13 }
 0x3d2   :  { %v1716_v56 = vsel %vm1715_vm9, %v1714_v47, -inf }
 0x3d3   :  { %1717 = vmax.xlane.f32.xlu1 %v1716_v56 }
 0x45c   :  { %v1718_v54 = vpop.xlane.xlu1 %1717 }
 0x45d   :  { %v1719_v50 = vrot.slane %v1718_v54, 4 }
 0x45f   :  { %v1720_v4 = vmax.f32 %v1718_v54, %v1719_v50 }
 0x461   :  { %v1721_v57 = vrot.slane %v1720_v4, 2 }
 0x463   :  { %v1722_v35 = vmax.f32 %v1720_v4, %v1721_v57 }
 0x465   :  { %v1723_v11 = vrot.slane %v1722_v35, 1 }
 0x467   :  { %v1724_v42 = vmax.f32 %v1722_v35, %v1723_v11 }
 0x469   :  { %3956 = vpush %v1724_v42 }
 0x49a   :  { %s3957_s19 = spop %3956 }
 0x49b   :  { %p1726_p13 = scmp.gt.f32.partialorder %s3957_s19, 0.0 }
 0x49c   :  { %v1730_v18 = vsub.f32 (%p1726_p13), %v1690_v28, %v1712_v1  ;;  %v1733_v17 = vld [vmem:[#allocation4] sm:$0xff] (%p1726_p13)  ;;  %v1734_v5 = vld [vmem:[#allocation4 + $0x8] sm:$0xff] (%p1726_p13)  ;;  %v1745_v22 = vld [vmem:[#allocation5 + $0x8] sm:$0xff] (%p1726_p13) }
 0x49d   :  { %1729 = sbr.rel (!%p1726_p13) target bundleno = 1204 (0x4b4), region = 173  ;;  %v1746_v6 = vld [vmem:[#allocation5] sm:$0xff] (%p1726_p13) }
 0x49e   :  { %v1731_v24 = vmul.f32 (%p1726_p13), 1.442695, %v1730_v18 }
 0x4a0   :  { %4069 = vpow2.f32 (%p1726_p13), %v1731_v24 }
 0x4ad   :  { %v4070_v40 = vpop.eup %4069 }
 0x4ae   :  { %v1739_v8 = vrot.slane %v4070_v40, %v4704_v63 }
 0x4b0   :  { %v1741_v45 = vmul.f32 %v1739_v8, %v1733_v17  ;;  %v1742_v20 = vmul.f32 %v1739_v8, %v1734_v5  ;;  %v1747_v52 = vmul.f32 %v1745_v22, %v1739_v8  ;;  %v1748_v44 = vmul.f32 %v1746_v6, %v1739_v8 }
 0x4b2   :  { %1743 = vst [vmem:[#allocation4] sm:$0xff] %v1741_v45  ;;  %1744 = vst [vmem:[#allocation4 + $0x8] sm:$0xff] %v1742_v20 }
 0x4b3   :  { %1749 = vst [vmem:[#allocation5 + $0x8] sm:$0xff] %v1747_v52  ;;  %1750 = vst [vmem:[#allocation5] sm:$0xff] %v1748_v44 }
 0x4b4 PF:  { %1751 = vst [vmem:[#allocation3] sm:$0x1] %v1712_v1  ;;  %v5182_v51 = vmov 0.0   ;;  %v1756_v10 = vrot.slane %v1712_v1, %v4704_v63  ;;  %s5188_s21 = sld [smem:[#allocation38_spill]]  ;;  %vm2407_vm11 = vcmask 15360  }
 0x4b5   :  { %3768 = vmatprep.subr.bf16.mxu1 %v5182_v51  ;;  %3788 = vmatprep.subr.bf16.mxu0 %v5182_v51  ;;  %s5189_s16 = sld [smem:[#allocation39_spill]] }
 0x4b6   :  { %3784 = vmatprep.mubr.msk.bf16.mxu1 %vm4469_vm0, %v5182_v51  ;;  %3804 = vmatprep.mubr.msk.bf16.mxu0 %vm4469_vm0, %v5182_v51  ;;  %v1772_v36 = vsub.f32 %v4928_v58, %v1756_v10  ;;  %v1773_v14 = vsub.f32 %v4948_v7, %v1756_v10  ;;  %v1770_v26 = vsub.f32 %v4937_v34, %v1756_v10  ;;  %s5190_s0 = sld [smem:[#allocation42_spill]] }
 0x4b7   :  { %v1771_v59 = vsub.f32 %v4956_v0, %v1756_v10  ;;  %v1768_v30 = vsub.f32 %v4908_v49, %v1756_v10  ;;  %v1769_v63 = vsub.f32 %v4918_v2, %v1756_v10  ;;  %v1766_v61 = vsub.f32 %v4913_v55, %v1756_v10  ;;  %s5191_s7 = sld [smem:[#allocation40_spill]] }
 0x4b8   :  { %v1767_v12 = vsub.f32 %v4923_v3, %v1756_v10  ;;  %v1802_v38 = vmul.f32 1.442695, %v1772_v36  ;;  %v1804_v28 = vmul.f32 1.442695, %v1773_v14  ;;  %v1798_v62 = vmul.f32 1.442695, %v1770_v26 }
 0x4b9   :  { %v1764_v1 = vsub.f32 %v4888_v16, %v1756_v10  ;;  %v1800_v58 = vmul.f32 1.442695, %v1771_v59  ;;  %v1794_v13 = vmul.f32 1.442695, %v1768_v30  ;;  %v1796_v7 = vmul.f32 1.442695, %v1769_v63 }
 0x4ba   :  { %v1765_v34 = vsub.f32 %v4898_v60, %v1756_v10  ;;  %4111 = vpow2.f32 %v1802_v38  ;;  %v1790_v0 = vmul.f32 1.442695, %v1766_v61  ;;  %v1792_v47 = vmul.f32 1.442695, %v1767_v12  ;;  %s5192_s10 = sld [smem:[#allocation41_spill]] }
 0x4bb   :  { %v1786_v49 = vmul.f32 1.442695, %v1764_v1  ;;  %4113 = vpow2.f32 %v1804_v28  ;;  %v1762_v55 = vsub.f32 %v4893_v32, %v1756_v10  ;;  %v1763_v3 = vsub.f32 %v4903_v48, %v1756_v10  ;;  %v5183_v28 = vld [vmem:[#allocation49_spill] sm:$0xff]  ;;  %v5184_v1 = vld [vmem:[#allocation50_spill] sm:$0xff]  ;;  %s5193_s30 = sld [smem:[#allocation43_spill]] }
 0x4bc   :  { %v1788_v2 = vmul.f32 1.442695, %v1765_v34  ;;  %4115 = vpow2.f32 %v1798_v62  ;;  %v1760_v56 = vsub.f32 %v4868_v9, %v1756_v10  ;;  %v1761_v16 = vsub.f32 %v4878_v53, %v1756_v10  ;;  %v5185_v34 = vld [vmem:[#allocation47_spill] sm:$0xff]  ;;  %s5194_s11 = sld [smem:[#allocation44_spill]] }
 0x4bd   :  { %v1758_v54 = vsub.f32 %v4873_v15, %v1756_v10  ;;  %4117 = vpow2.f32 %v1800_v58  ;;  %v1782_v50 = vmul.f32 1.442695, %v1762_v55  ;;  %v1784_v60 = vmul.f32 1.442695, %v1763_v3  ;;  %v5187_v3 = vld [vmem:[#allocation46_spill] sm:$0xff]  ;;  %s5195_s15 = sld [smem:[#allocation45_spill]] }
 0x4be   :  { %v1759_v4 = vsub.f32 %v4883_v46, %v1756_v10  ;;  %4119 = vpow2.f32 %v1794_v13  ;;  %v1778_v57 = vmul.f32 1.442695, %v1760_v56  ;;  %v1780_v35 = vmul.f32 1.442695, %v1761_v16  ;;  %v4071_v56 = vld [vmem:[#allocation17 + $0x38] sm:$0xff]   ;;  %v4072_v16 = vld [vmem:[#allocation17 + $0x30] sm:$0xff]  }
 0x4bf   :  { %v1774_v11 = vmul.f32 1.442695, %v1758_v54  ;;  %4121 = vpow2.f32 %v1796_v7  ;;  %v4073_v54 = vld [vmem:[#allocation17 + $0x28] sm:$0xff]  }
 0x4c0   :  { %v1776_v32 = vmul.f32 1.442695, %v1759_v4  ;;  %4123 = vpow2.f32 %v1790_v0  ;;  %v4076_v4 = vld [vmem:[#allocation17 + $0x10] sm:$0xff]  }
 0x4c1   :  { %4125 = vpow2.f32 %v1792_v47  ;;  %v5186_v47 = vld [vmem:[#allocation48_spill] sm:$0xff] }
 0x4c2   :  { %4127 = vpow2.f32 %v1786_v49 }
 0x4c3   :  { %4129 = vpow2.f32 %v1788_v2 }
 0x4c4   :  { %4131 = vpow2.f32 %v1782_v50  ;;  %v4074_v50 = vld [vmem:[#allocation17 + $0x20] sm:$0xff]  }
 0x4c5   :  { %4133 = vpow2.f32 %v1784_v60  ;;  %v4075_v60 = vld [vmem:[#allocation17 + $0x18] sm:$0xff]  }
 0x4c6   :  { %4135 = vpow2.f32 %v1778_v57  ;;  %v4077_v57 = vld [vmem:[#allocation17 + $0x8] sm:$0xff]  }
 0x4c7   :  { %v4112_v48 = vpop.eup %4111  ;;  %4137 = vpow2.f32 %v1780_v35  ;;  %v4078_v35 = vld [vmem:[#allocation17] sm:$0xff]  }
 0x4c8   :  { %v4114_v9 = vpop.eup %4113  ;;  %v1877_v53 = vmul.f32 %v4112_v48, %v4815_v41  ;;  %4139 = vpow2.f32 %v1774_v11  ;;  %v4079_v11 = vld [vmem:[#allocation20 + $0x38] sm:$0xff]  }
 0x4c9   :  { %v4116_v15 = vpop.eup %4115  ;;  %v1815_v42 = vpack.c.bf16 %v4114_v9, %v4112_v48  ;;  %v1878_v18 = vmul.f32 %v4114_v9, %v4819_v43  ;;  %4141 = vpow2.f32 %v1776_v32  ;;  %v4080_v32 = vld [vmem:[#allocation20 + $0x30] sm:$0xff]   ;;  %v4082_v48 = vld [vmem:[#allocation20 + $0x28] sm:$0xff]   ;;  %v4084_v9 = vld [vmem:[#allocation20 + $0x20] sm:$0xff]  }
 0x4ca   :  { %v4118_v24 = vpop.eup %4117  ;;  %v1875_v46 = vmul.f32 %v4116_v15, %v4807_v37 }
 0x4cb   :  { %v4120_v17 = vpop.eup %4119  ;;  %3769 = vmatpush3.bf16.msra.mxu1 %v1815_v42  ;;  %v1814_v40 = vpack.c.bf16 %v4118_v24, %v4116_v15  ;;  %v1886_v5 = vpack.c.bf16 %v1878_v18, %v1877_v53  ;;  %v1876_v22 = vmul.f32 %v4118_v24, %v4811_v39  ;;  %v4086_v53 = vld [vmem:[#allocation20 + $0x18] sm:$0xff]   ;;  %v4088_v15 = vld [vmem:[#allocation20 + $0x10] sm:$0xff]   ;;  %v4090_v42 = vld [vmem:[#allocation20 + $0x8] sm:$0xff]  }
 0x4cc   :  { %v4122_v6 = vpop.eup %4121  ;;  %3770 = vmatprep.subr.bf16.mxu1 %v5182_v51  ;;  %v1873_v8 = vmul.f32 %v4120_v17, %v4799_v31  ;;  %v1806_v18 = vld [vmem:[#allocation4] sm:$0xff] }
 0x4cd   :  { %3789 = vmatpush3.bf16.msra.mxu0 %v1886_v5  ;;  %v1885_v41 = vpack.c.bf16 %v1876_v22, %v1875_v46  ;;  %v1874_v43 = vmul.f32 %v4122_v6, %v4803_v33  ;;  %v4124_v37 = vpop.eup %4123  ;;  %v1813_v45 = vpack.c.bf16 %v4122_v6, %v4120_v17  ;;  %v1861_v46 = vld [vmem:[#allocation5 + $0x8] sm:$0xff]  ;;  %v1807_v5 = vld [vmem:[#allocation4 + $0x8] sm:$0xff] }
 0x4ce   :  { %3790 = vmatprep.subr.bf16.mxu0 %v5182_v51  ;;  %v4126_v20 = vpop.eup %4125  ;;  %v1871_v52 = vmul.f32 %v4124_v37, %v4791_v27 }
 0x4cf   :  { %3771 = vmatpush3.bf16.msra.mxu1 %v1814_v40  ;;  %v1884_v39 = vpack.c.bf16 %v1874_v43, %v1873_v8  ;;  %v1872_v44 = vmul.f32 %v4126_v20, %v4795_v29  ;;  %v4128_v31 = vpop.eup %4127  ;;  %v1812_v33 = vpack.c.bf16 %v4126_v20, %v4124_v37  ;;  %v1862_v37 = vld [vmem:[#allocation5] sm:$0xff] }
 0x4d0   :  { %3772 = vmatprep.subr.bf16.mxu1 %v5182_v51  ;;  %v4130_v10 = vpop.eup %4129  ;;  %v1869_v14 = vmul.f32 %v4128_v31, %v4783_v23 }
 0x4d1   :  { %3791 = vmatpush3.bf16.msra.mxu0 %v1885_v41  ;;  %v1883_v36 = vpack.c.bf16 %v1872_v44, %v1871_v52  ;;  %v1870_v26 = vmul.f32 %v4130_v10, %v4787_v25  ;;  %v4132_v27 = vpop.eup %4131  ;;  %v1811_v29 = vpack.c.bf16 %v4130_v10, %v4128_v31 }
 0x4d2   :  { %3792 = vmatprep.subr.bf16.mxu0 %v5182_v51  ;;  %v4134_v59 = vpop.eup %4133  ;;  %v1867_v63 = vmul.f32 %v4132_v27, %v4775_v19 }
 0x4d3   :  { %3773 = vmatpush3.bf16.msra.mxu1 %v1813_v45  ;;  %v1882_v30 = vpack.c.bf16 %v1870_v26, %v1869_v14  ;;  %v1868_v61 = vmul.f32 %v4134_v59, %v4779_v21  ;;  %v4136_v12 = vpop.eup %4135  ;;  %v1810_v23 = vpack.c.bf16 %v4134_v59, %v4132_v27  ;;  %v4081_v26 = vld [vmem:[#allocation18 + $0x38] sm:$0xff]   ;;  %v4085_v59 = vld [vmem:[#allocation18 + $0x28] sm:$0xff]  }
 0x4d4   :  { %3774 = vmatprep.subr.bf16.mxu1 %v5182_v51  ;;  %v4138_v25 = vpop.eup %4137  ;;  %v1865_v62 = vmul.f32 %v4136_v12, %v5183_v28 }
 0x4d5   :  { %3793 = vmatpush3.bf16.msra.mxu0 %v1884_v39  ;;  %v1881_v38 = vpack.c.bf16 %v1868_v61, %v1867_v63  ;;  %v1866_v58 = vmul.f32 %v4138_v25, %v5184_v1  ;;  %v4140_v13 = vpop.eup %4139  ;;  %v1809_v19 = vpack.c.bf16 %v4138_v25, %v4136_v12  ;;  %v4089_v63 = vld [vmem:[#allocation18 + $0x18] sm:$0xff]   ;;  %v4091_v61 = vld [vmem:[#allocation18 + $0x10] sm:$0xff]   ;;  %v4092_v12 = vld [vmem:[#allocation20] sm:$0xff]  }
 0x4d6   :  { %3794 = vmatprep.subr.bf16.mxu0 %v5182_v51  ;;  %v4142_v21 = vpop.eup %4141  ;;  %v1863_v0 = vmul.f32 %v4140_v13, %v5185_v34  ;;  %v1935_v25 = vld [vmem:[#allocation6] sm:$0xff] }
 0x4d7   :  { %3775 = vmatpush3.bf16.msra.mxu1 %v1812_v33  ;;  %v1880_v7 = vpack.c.bf16 %v1866_v58, %v1865_v62  ;;  %v1864_v49 = vmul.f32 %v4142_v21, %v5186_v47  ;;  %v1808_v2 = vpack.c.bf16 %v4142_v21, %v4140_v13  ;;  %v4094_v62 = vld [vmem:[#allocation18] sm:$0xff]   ;;  %v3382_v58 = vld [vmem:[%s5188_s21] ss:$0 sm:$0xff] }
 0x4d8   :  { %3776 = vmatprep.subr.bf16.mxu1 %v5182_v51 }
 0x4d9   :  { %3795 = vmatpush3.bf16.msra.mxu0 %v1883_v36  ;;  %v1879_v55 = vpack.c.bf16 %v1864_v49, %v1863_v0 }
 0x4da   :  { %3796 = vmatprep.subr.bf16.mxu0 %v5182_v51 }
 0x4db   :  { %3777 = vmatpush3.bf16.msra.mxu1 %v1811_v29  ;;  %v4083_v29 = vld [vmem:[#allocation18 + $0x30] sm:$0xff]  }
 0x4dc   :  { %3778 = vmatprep.subr.bf16.mxu1 %v5182_v51 }
 0x4dd   :  { %3797 = vmatpush3.bf16.msra.mxu0 %v1882_v30  ;;  %v4087_v30 = vld [vmem:[#allocation18 + $0x20] sm:$0xff]  }
 0x4de   :  { %3798 = vmatprep.subr.bf16.mxu0 %v5182_v51 }
 0x4df   :  { %3779 = vmatpush3.bf16.msra.mxu1 %v1810_v23  ;;  %v4093_v23 = vld [vmem:[#allocation18 + $0x8] sm:$0xff]  }
 0x4e0   :  { %3780 = vmatprep.subr.bf16.mxu1 %v5182_v51 }
 0x4e1   :  { %3799 = vmatpush3.bf16.msra.mxu0 %v1881_v38  ;;  %v1936_v38 = vld [vmem:[#allocation6 + $0x8] sm:$0xff] }
 0x4e2   :  { %3800 = vmatprep.subr.bf16.mxu0 %v5182_v51  ;;  %v2079_v28 = vpack.c.bf16 %v1936_v38, %v1935_v25 }
 0x4e3   :  { %3781 = vmatpush3.bf16.msra.mxu1 %v1809_v19 }
 0x4e4   :  { %3782 = vmatprep.subr.bf16.mxu1 %v5182_v51 }
 0x4e5   :  { %3801 = vmatpush3.bf16.msra.mxu0 %v1880_v7 }
 0x4e6   :  { %3802 = vmatprep.subr.bf16.mxu0 %v5182_v51 }
 0x4e7   :  { %3783 = vmatpush3.bf16.msra.mxu1 %v1808_v2 }
 0x4e8   :  { %3808 = vmatprep.subr.bf16.mxu1 %v5182_v51 }
 0x4e9   :  { %3803 = vmatpush3.bf16.msra.mxu0 %v1879_v55 }
 0x4ea   :  { %3785 = vmatmul.mubr.bf16.vlgmr.msra.gmra.mxu1 %v5187_v3  ;;  %3828 = vmatprep.subr.bf16.mxu0 %v5182_v51 }
 0x4eb   :  { %3824 = vmatprep.mubr.msk.bf16.mxu1 %vm4469_vm0, %v5182_v51  ;;  %3809 = vmatpush3.bf16.msra.mxu1 %v4071_v56 }
 0x4ec   :  { %3805 = vmatmul.mubr.bf16.vlgmr.msra.gmra.mxu0 %v5187_v3  ;;  %3810 = vmatprep.subr.bf16.mxu1 %v5182_v51  ;;  %v1937_v3 = vld [vmem:[#allocation9] sm:$0x3] }
 0x4ed   :  { %3844 = vmatprep.mubr.msk.bf16.mxu0 %vm4469_vm0, %v5182_v51  ;;  %3829 = vmatpush3.bf16.msra.mxu0 %v4079_v11 }
 0x4ee   :  { %3830 = vmatprep.subr.bf16.mxu0 %v5182_v51  ;;  %2375 = vxpose.xlu0.b32.start.end [1/1] (short) (narrow) %v1937_v3, 16 }
 0x4ef   :  { %3811 = vmatpush3.bf16.msra.mxu1 %v4072_v16  ;;  %v3407_v16 = vld [vmem:[%s5189_s16] ss:$0 sm:$0xff] }
 0x4f0   :  { %3812 = vmatprep.subr.bf16.mxu1 %v5182_v51 }
 0x4f1   :  { %3831 = vmatpush3.bf16.msra.mxu0 %v4080_v32 }
 0x4f2   :  { %3832 = vmatprep.subr.bf16.mxu0 %v5182_v51 }
 0x4f3   :  { %3813 = vmatpush3.bf16.msra.mxu1 %v4073_v54 }
 0x4f4   :  { %3814 = vmatprep.subr.bf16.mxu1 %v5182_v51 }
 0x4f5   :  { %3833 = vmatpush3.bf16.msra.mxu0 %v4082_v48 }
 0x4f6   :  { %3834 = vmatprep.subr.bf16.mxu0 %v5182_v51 }
 0x4f7   :  { %3815 = vmatpush3.bf16.msra.mxu1 %v4074_v50 }
 0x4f8   :  { %3816 = vmatprep.subr.bf16.mxu1 %v5182_v51 }
 0x4f9   :  { %3835 = vmatpush3.bf16.msra.mxu0 %v4084_v9 }
 0x4fa   :  { %3836 = vmatprep.subr.bf16.mxu0 %v5182_v51 }
 0x4fb   :  { %3817 = vmatpush3.bf16.msra.mxu1 %v4075_v60 }
 0x4fc   :  { %3818 = vmatprep.subr.bf16.mxu1 %v5182_v51 }
 0x4fd   :  { %3837 = vmatpush3.bf16.msra.mxu0 %v4086_v53 }
 0x4fe   :  { %3838 = vmatprep.subr.bf16.mxu0 %v5182_v51 }
 0x4ff   :  { %3819 = vmatpush3.bf16.msra.mxu1 %v4076_v4 }
 0x500   :  { %3820 = vmatprep.subr.bf16.mxu1 %v5182_v51 }
 0x501   :  { %3839 = vmatpush3.bf16.msra.mxu0 %v4088_v15 }
 0x502   :  { %3840 = vmatprep.subr.bf16.mxu0 %v5182_v51 }
 0x503   :  { %3821 = vmatpush3.bf16.msra.mxu1 %v4077_v57 }
 0x504   :  { %3822 = vmatprep.subr.bf16.mxu1 %v5182_v51 }
 0x505   :  { %3841 = vmatpush3.bf16.msra.mxu0 %v4090_v42 }
 0x506   :  { %3842 = vmatprep.subr.bf16.mxu0 %v5182_v51 }
 0x507   :  { %3823 = vmatpush3.bf16.msra.mxu1 %v4078_v35 }
 0x508   :  { %3848 = vmatprep.subr.bf16.mxu1 %v5182_v51 }
 0x509   :  { %3843 = vmatpush3.bf16.msra.mxu0 %v4092_v12  ;;  %v4102_v12 = vld [vmem:[#allocation21] sm:$0xff]  }
 0x50a   :  { %3868 = vmatprep.subr.mxu0 %v5182_v51 }
 0x50c   :  { %3845 = vmatmul.mubr.bf16.vlgmr.msra.gmra.mxu0 %v2079_v28  ;;  %v4106_v28 = vld [vmem:[#allocation23 + $0x20] sm:$0xff]  }
 0x50d   :  { %3872 = vmatprep.mubr.msk.f32.mxu0 %vm4469_vm0, %v5182_v51 }
 0x5aa   :  { %v1850_v24 = vpop.f32.mrf.mxu1 }
 0x5ab   :  { %v1857_v17 = vadd.f32 %v1850_v24, %v1806_v18 }
 0x5ac   :  { %v3786_v40 = vpop.f32.mrf.mxu1  ;;  %v1921_v22 = vpop.f32.mrf.mxu0 }
 0x5ad   :  { %1859 = vst [vmem:[#allocation4] sm:$0xff] %v1857_v17  ;;  %v1928_v6 = vadd.f32 %v1921_v22, %v1861_v46  ;;  %v1943_v41 = vadd.f32 1e-16, %v1857_v17  ;;  %v5063_v22 = vld [vmem:[#allocation11] sm:$0x3] }
 0x5ae   :  { %v1853_v8 = vpop.f32.mrf.mxu1  ;;  %v3806_v43 = vpop.f32.mrf.mxu0 }
 0x5af   :  { %v1858_v45 = vadd.f32 %v1853_v8, %v1807_v5  ;;  %1930 = vst [vmem:[#allocation5 + $0x8] sm:$0xff] %v1928_v6  ;;  %4143 = vrcp.f32 %v1943_v41 }
 0x5b0   :  { %v3787_v20 = vpop.f32.mrf.mxu1  ;;  %v1924_v39 = vpop.f32.mrf.mxu0 }
 0x5b1   :  { %1860 = vst [vmem:[#allocation4 + $0x8] sm:$0xff] %v1858_v45  ;;  %v1929_v52 = vadd.f32 %v1924_v39, %v1862_v37  ;;  %v1944_v44 = vadd.f32 1e-16, %v1858_v45  ;;  %v3414_v37 = vld [vmem:[%s5190_s0] ss:$0 sm:$0xff] }
 0x5b2   :  { %v3807_v31 = vpop.f32.mrf.mxu0 }
 0x5b3   :  { %1931 = vst [vmem:[#allocation5] sm:$0xff] %v1929_v52  ;;  %4145 = vrcp.f32 %v1944_v44 }
 0x5bc   :  { %v4144_v33 = vpop.eup %4143 }
 0x5bd   :  { %v1947_v36 = vmul.f32 %v4144_v33, %v1928_v6  ;;  %v5066_v6 = vpop.trf.xlu0 }
 0x5c0   :  { %v4146_v10 = vpop.eup %4145 }
 0x5c1   :  { %v1948_v14 = vmul.f32 %v4146_v10, %v1929_v52  ;;  %v5072_v8 = vpop.trf.xlu0 }
 0x5c3   :  { %v1949_v27 = vpack.c.bf16 %v1948_v14, %v1947_v36  ;;  %v4095_v14 = vld [vmem:[#allocation21 + $0x38] sm:$0xff]  }
 0x5c5   :  { %3825 = vmatmul.mubr.bf16.vlgmr.msra.gmra.mxu1 %v1949_v27  ;;  %v4096_v27 = vld [vmem:[#allocation21 + $0x30] sm:$0xff]  }
 0x5c6   :  { %3849 = vmatpush3.bf16.msra.mxu1 %v4081_v26  ;;  %3864 = vmatprep.mubr.msk.bf16.mxu1 %vm4469_vm0, %v5182_v51 }
 0x5c7   :  { %3850 = vmatprep.subr.bf16.mxu1 %v5182_v51 }
 0x5ca   :  { %3851 = vmatpush3.bf16.msra.mxu1 %v4083_v29  ;;  %v4097_v29 = vld [vmem:[#allocation21 + $0x28] sm:$0xff]  }
 0x5cb   :  { %3852 = vmatprep.subr.bf16.mxu1 %v5182_v51 }
 0x5cc   :  { %v2178_v47 = vpop.f32.mrf.mxu0 }
 0x5ce   :  { %3853 = vmatpush3.bf16.msra.mxu1 %v4085_v59  ;;  %v3846_v49 = vpop.f32.mrf.mxu0  ;;  %v4098_v59 = vld [vmem:[#allocation21 + $0x20] sm:$0xff]  }
 0x5cf   :  { %3854 = vmatprep.subr.bf16.mxu1 %v5182_v51 }
 0x5d0   :  { %v2181_v2 = vpop.f32.mrf.mxu0 }
 0x5d2   :  { %3855 = vmatpush3.bf16.msra.mxu1 %v4087_v30  ;;  %v3847_v55 = vpop.f32.mrf.mxu0  ;;  %v4099_v30 = vld [vmem:[#allocation21 + $0x18] sm:$0xff]  }
 0x5d3   :  { %3856 = vmatprep.subr.bf16.mxu1 %v5182_v51 }
 0x5d6   :  { %3857 = vmatpush3.bf16.msra.mxu1 %v4089_v63  ;;  %v4100_v63 = vld [vmem:[#allocation21 + $0x10] sm:$0xff]  }
 0x5d7   :  { %3858 = vmatprep.subr.bf16.mxu1 %v5182_v51 }
 0x5da   :  { %3859 = vmatpush3.bf16.msra.mxu1 %v4091_v61  ;;  %v4101_v61 = vld [vmem:[#allocation21 + $0x8] sm:$0xff]  }
 0x5db   :  { %3860 = vmatprep.subr.bf16.mxu1 %v5182_v51 }
 0x5de   :  { %3861 = vmatpush3.bf16.msra.mxu1 %v4093_v23  ;;  %v4103_v23 = vld [vmem:[#allocation23 + $0x38] sm:$0xff]  }
 0x5df   :  { %3862 = vmatprep.subr.bf16.mxu1 %v5182_v51 }
 0x5e2   :  { %3863 = vmatpush3.bf16.msra.mxu1 %v4094_v62  ;;  %v4107_v62 = vld [vmem:[#allocation23 + $0x18] sm:$0xff]  }
 0x5e3   :  { %3912 = vmatprep.subr.bf16.mxu1 %v5182_v51 }
 0x685   :  { %v2055_v1 = vpop.f32.mrf.mxu1 }
 0x686   :  { %v2056_v21 = vadd.f32 %v3382_v58, %v2055_v1 }
 0x687   :  { %v3826_v13 = vpop.f32.mrf.mxu1 }
 0x689   :  { %v2058_v19 = vpop.f32.mrf.mxu1 }
 0x68a   :  { %v2059_v7 = vadd.f32 %v3382_v58, %v2058_v19 }
 0x68b   :  { %v3827_v34 = vpop.f32.mrf.mxu1 }
 0x68c   :  { %v2062_v0 = vpack.c.bf16 %v2059_v7, %v2056_v21 }
 0x68e   :  { %3865 = vmatmul.mubr.bf16.vlgmr.msra.gmra.mxu1 %v2062_v0 }
 0x68f   :  { %3928 = vmatprep.mubr.msk.bf16.mxu1 %vm4469_vm0, %v5182_v51  ;;  %3913 = vmatpush3.bf16.msra.mxu1 %v4103_v23 }
 0x690   :  { %3914 = vmatprep.subr.bf16.mxu1 %v5182_v51 }
 0x74e   :  { %v2267_v56 = vpop.f32.mrf.mxu1 }
 0x74f   :  { %v2268_v54 = vadd.f32 %v2267_v56, %v2178_v47 }
 0x750   :  { %v3866_v50 = vpop.f32.mrf.mxu1 }
 0x751   :  { %v2281_v60 = vadd.f32 %v3407_v16, %v2268_v54  ;;  %v4108_v54 = vld [vmem:[#allocation23 + $0x10] sm:$0xff]   ;;  %v4109_v50 = vld [vmem:[#allocation23 + $0x8] sm:$0xff]  }
 0x752   :  { %v2270_v4 = vpop.f32.mrf.mxu1 }
 0x753   :  { %v3408_v57 = vmul.f32 -1.442695, %v2281_v60  ;;  %v2271_v35 = vadd.f32 %v2270_v4, %v2181_v2  ;;  %v3420_v2 = vld [vmem:[%s5192_s10] ss:$0 sm:$0xff]  ;;  %v4110_v60 = vld [vmem:[#allocation23] sm:$0xff]  }
 0x754   :  { %v3867_v11 = vpop.f32.mrf.mxu1  ;;  %v3421_v4 = vld [vmem:[%s5193_s30] ss:$0 sm:$0xff] }
 0x755   :  { %4147 = vpow2.f32 %v3408_v57  ;;  %v2282_v32 = vadd.f32 %v3407_v16, %v2271_v35 }
 0x757   :  { %v3409_v48 = vmul.f32 -1.442695, %v2282_v32 }
 0x759   :  { %4149 = vpow2.f32 %v3409_v48 }
 0x762   :  { %v4148_v9 = vpop.eup %4147 }
 0x763   :  { %v2289_v53 = vadd.f32 1.0, %v4148_v9 }
 0x765   :  { %4151 = vrcp.f32 %v2289_v53 }
 0x766   :  { %v4150_v15 = vpop.eup %4149 }
 0x767   :  { %v2290_v42 = vadd.f32 1.0, %v4150_v15 }
 0x769   :  { %4153 = vrcp.f32 %v2290_v42 }
 0x772   :  { %v5057_v18 = vpop.eup %4151 }
 0x773   :  { %v2295_v17 = vmul.f32 %v5057_v18, %v2056_v21  ;;  %v3416_v21 = vld [vmem:[%s5191_s7] ss:$0 sm:$0xff] }
 0x775   :  { %v2297_v5 = vadd.f32 %v2295_v17, %v1935_v25  ;;  %v4104_v25 = vld [vmem:[#allocation23 + $0x30] sm:$0xff]  }
 0x776   :  { %v5059_v24 = vpop.eup %4153  ;;  %3915 = vmatpush3.bf16.msra.mxu1 %v4104_v25 }
 0x777   :  { %v2296_v46 = vmul.f32 %v5059_v24, %v2059_v7  ;;  %3916 = vmatprep.subr.bf16.mxu1 %v5182_v51 }
 0x779   :  { %v2298_v40 = vadd.f32 %v2296_v46, %v1936_v38  ;;  %v4105_v38 = vld [vmem:[#allocation23 + $0x28] sm:$0xff]  }
 0x77a   :  { %3917 = vmatpush3.bf16.msra.mxu1 %v4105_v38 }
 0x77b   :  { %3869 = vmatpush3.msra.mxu0 %v2298_v40  ;;  %3918 = vmatprep.subr.bf16.mxu1 %v5182_v51 }
 0x77c   :  { %3870 = vmatprep.subr.mxu0 %v5182_v51 }
 0x77d   :  { %3871 = vmatpush3.msra.mxu0 %v2297_v5 }
 0x77e   :  { %3873 = vmatmul.mubr.msk.f32.vlgmr.msra.gmra.mxu0 %vm991_vm4, %v5063_v22  ;;  %3919 = vmatpush3.bf16.msra.mxu1 %v4106_v28 }
 0x77f   :  { %3877 = vmatprep.mubr.msk.f32.mxu0 %vm2407_vm11, %v5066_v6  ;;  %3920 = vmatprep.subr.bf16.mxu1 %v5182_v51 }
 0x782   :  { %3921 = vmatpush3.bf16.msra.mxu1 %v4107_v62  ;;  %v3449_v62 = vld [vmem:[%s4620_s27] ss:$0 sm:$0xff] }
 0x783   :  { %3922 = vmatprep.subr.bf16.mxu1 %v5182_v51 }
 0x786   :  { %3923 = vmatpush3.bf16.msra.mxu1 %v4108_v54 }
 0x787   :  { %3924 = vmatprep.subr.bf16.mxu1 %v5182_v51 }
 0x78a   :  { %3925 = vmatpush3.bf16.msra.mxu1 %v4109_v50 }
 0x78b   :  { %3926 = vmatprep.subr.bf16.mxu1 %v5182_v51 }
 0x78e   :  { %3927 = vmatpush3.bf16.msra.mxu1 %v4110_v60 }
 0x78f   :  { %3944 = vmatprep.subr.mxu1 %v5182_v51 }
 0x83e   :  { %v2371_v41 = vpop.f32.mrf.mxu0 }
 0x83f   :  { %3875 = vmatprep.subr.msk.mxu0 %vm629_vm1, %v2371_v41 }
 0x840   :  { %v3874_v43 = vpop.f32.mrf.mxu0  ;;  %3876 = vmatpush3.msk.msra.mxu0 %vm629_vm1, %v2371_v41 }
 0x841   :  { %3878 = vmatmul.mubr.msk.f32.vlgmr.msra.gmra.mxu0 %vm2407_vm11, %v5072_v8  ;;  %3880 = vmatprep.subr.mxu0 %v5182_v51 }
 0x842   :  { %3884 = vmatprep.mubr.msk.f32.mxu0 %vm4469_vm0, %v5182_v51 }
 0x901   :  { %v3879_v45 = vpop.f32.mrf.mxu0 }
 0x902   :  { %v2499_v20 = vmul.f32 %v3879_v45, %v3414_v37 }
 0x903   :  { %v2483_v39 = vpop.f32.mrf.mxu0 }
 0x904   :  { %v5082_v52 = vsub.f32 %v2298_v40, %v2499_v20  ;;  %v2498_v44 = vmul.f32 %v3414_v37, %v2483_v39  ;;  %v3430_v40 = vld [vmem:[%s5194_s11] ss:$0 sm:$0xff] }
 0x906   :  { %v2503_v31 = vmul.f32 %v5082_v52, %v5082_v52  ;;  %v2500_v33 = vsub.f32 %v2297_v5, %v2498_v44  ;;  %v2581_v7 = vmul.f32 %v3416_v21, %v5082_v52 }
 0x908   :  { %v2502_v10 = vmul.f32 %v2500_v33, %v2500_v33  ;;  %3881 = vmatpush3.msra.mxu0 %v2503_v31  ;;  %v2580_v0 = vmul.f32 %v3416_v21, %v2500_v33 }
 0x909   :  { %3882 = vmatprep.subr.mxu0 %v5182_v51 }
 0x90a   :  { %3883 = vmatpush3.msra.mxu0 %v2502_v10 }
 0x90b   :  { %3885 = vmatmul.mubr.msk.f32.vlgmr.msra.gmra.mxu0 %vm991_vm4, %v5063_v22 }
 0x90c   :  { %3889 = vmatprep.mubr.msk.f32.mxu0 %vm2407_vm11, %v5066_v6 }
 0x9cb   :  { %v2570_v36 = vpop.f32.mrf.mxu0 }
 0x9cc   :  { %3887 = vmatprep.subr.msk.mxu0 %vm629_vm1, %v2570_v36 }
 0x9cd   :  { %v3886_v26 = vpop.f32.mrf.mxu0  ;;  %3888 = vmatpush3.msk.msra.mxu0 %vm629_vm1, %v2570_v36 }
 0x9ce   :  { %3890 = vmatmul.mubr.msk.f32.vlgmr.msra.gmra.mxu0 %vm2407_vm11, %v5072_v8  ;;  %3892 = vmatprep.subr.bf16.mxu0 %v5182_v51 }
 0x9cf   :  { %3893 = vmatpush3.bf16.msra.mxu0 %v4095_v14  ;;  %3908 = vmatprep.mubr.msk.bf16.mxu0 %vm4469_vm0, %v5182_v51 }
 0x9d0   :  { %3894 = vmatprep.subr.bf16.mxu0 %v5182_v51 }
 0x9d3   :  { %3895 = vmatpush3.bf16.msra.mxu0 %v4096_v27 }
 0x9d4   :  { %3896 = vmatprep.subr.bf16.mxu0 %v5182_v51 }
 0x9d7   :  { %3897 = vmatpush3.bf16.msra.mxu0 %v4097_v29 }
 0x9d8   :  { %3898 = vmatprep.subr.bf16.mxu0 %v5182_v51 }
 0x9db   :  { %3899 = vmatpush3.bf16.msra.mxu0 %v4098_v59 }
 0x9dc   :  { %3900 = vmatprep.subr.bf16.mxu0 %v5182_v51 }
 0x9df   :  { %3901 = vmatpush3.bf16.msra.mxu0 %v4099_v30 }
 0x9e0   :  { %3902 = vmatprep.subr.bf16.mxu0 %v5182_v51 }
 0x9e3   :  { %3903 = vmatpush3.bf16.msra.mxu0 %v4100_v63 }
 0x9e4   :  { %3904 = vmatprep.subr.bf16.mxu0 %v5182_v51 }
 0x9e7   :  { %3905 = vmatpush3.bf16.msra.mxu0 %v4101_v61 }
 0x9e8   :  { %3906 = vmatprep.subr.bf16.mxu0 %v5182_v51 }
 0x9eb   :  { %3907 = vmatpush3.bf16.msra.mxu0 %v4102_v12 }
 0x9ec   :  { %3932 = vmatprep.subr.mxu0 %v5182_v51 }
 0xa8e   :  { %v3891_v1 = vpop.f32.mrf.mxu0 }
 0xa8f   :  { %v2657_v58 = vadd.f32 1e-05, %v3891_v1 }
 0xa90   :  { %v2651_v13 = vpop.f32.mrf.mxu0 }
 0xa91   :  { %4155 = vrsqrt.f32 %v2657_v58  ;;  %v2652_v19 = vadd.f32 1e-05, %v2651_v13 }
 0xa93   :  { %4157 = vrsqrt.f32 %v2652_v19 }
 0xa9e   :  { %v4156_v34 = vpop.eup %4155 }
 0xa9f   :  { %v2663_v47 = vmul.f32 %v4156_v34, %v2581_v7 }
 0xaa0   :  { %v4158_v49 = vpop.eup %4157 }
 0xaa1   :  { %v2662_v55 = vmul.f32 %v4158_v49, %v2580_v0  ;;  %v2671_v56 = vadd.f32 %v3420_v2, %v2663_v47 }
 0xaa3   :  { %v2670_v3 = vadd.f32 %v3420_v2, %v2662_v55 }
 0xaa5   :  { %v2672_v16 = vpack.c.bf16 %v2671_v56, %v2670_v3 }
 0xaa7   :  { %3909 = vmatmul.mubr.bf16.vlgmr.msra.gmra.mxu0 %v2672_v16 }
 0xaa8   :  { %3936 = vmatprep.mubr.msk.f32.mxu0 %vm4469_vm0, %v5182_v51 }
 0xb67   :  { %v2778_v57 = vpop.f32.mrf.mxu0 }
 0xb68   :  { %v2779_v35 = vadd.f32 %v3421_v4, %v2778_v57 }
 0xb69   :  { %v3910_v11 = vpop.f32.mrf.mxu0 }
 0xb6a   :  { %v2787_v48 = vmul.f32 0.01, %v2779_v35  ;;  %vm2785_vm12 = vcmp.ge.f32.partialorder %v2779_v35, 0.0 }
 0xb6b   :  { %v2781_v32 = vpop.f32.mrf.mxu0 }
 0xb6c   :  { %v2782_v9 = vadd.f32 %v3421_v4, %v2781_v32  ;;  %v2789_v42 = vsel %vm2785_vm12, %v2779_v35, %v2787_v48 }
 0xb6d   :  { %v3911_v53 = vpop.f32.mrf.mxu0 }
 0xb6e   :  { %vm2786_vm13 = vcmp.ge.f32.partialorder %v2782_v9, 0.0  ;;  %v2788_v15 = vmul.f32 0.01, %v2782_v9 }
 0xb70   :  { %v2790_v46 = vsel %vm2786_vm13, %v2782_v9, %v2788_v15 }
 0xb71   :  { %v2791_v17 = vpack.c.bf16 %v2790_v46, %v2789_v42 }
 0xb73   :  { %3929 = vmatmul.mubr.bf16.vlgmr.msra.gmra.mxu1 %v2791_v17 }
 0xb74   :  { %3948 = vmatprep.mubr.msk.f32.mxu1 %vm4469_vm0, %v5182_v51 }
 0xc33   :  { %v2897_v5 = vpop.f32.mrf.mxu1 }
 0xc34   :  { %v2898_v43 = vadd.f32 %v3430_v40, %v2897_v5 }
 0xc35   :  { %v3930_v41 = vpop.f32.mrf.mxu1 }
 0xc36   :  { %v2904_v39 = vmul.f32 %v5057_v18, %v2898_v43  ;;  %v3443_v18 = vld [vmem:[%s4625_s14] ss:$0 sm:$0xff]  ;;  %s4471_s14 = smov [#allocation24]  }
 0xc37   :  { %v2900_v37 = vpop.f32.mrf.mxu1  ;;  %s3246_s18 = sshll.u32 %s4471_s14, 4  ;;  %s3247_s18 = int_to_ptr.vmem [resolvable:$true] %s3246_s18 }
 0xc38   :  { %v2901_v45 = vadd.f32 %v3430_v40, %v2900_v37  ;;  %v2906_v31 = vadd.f32 %v2904_v39, %v2670_v3  ;;  %s4385_s22 = scalar_lea.vmem %s3247_s18, 256  ;;  %p4390_p1 = scmp.lt.s32.totalorder %s3247_s18, %s3247_s18 }
 0xc39   :  { %v3931_v20 = vpop.f32.mrf.mxu1  ;;  %p4386_p0 = scmp.ne.s32.totalorder %s3247_s18, %s4385_s22  ;;  %p4391_p2 = scmp.lt.s32.totalorder %s4385_s22, %s4385_s22 }
 0xc3a   :  { %v2905_v52 = vmul.f32 %v5059_v24, %v2901_v45 }
 0xc3b   :  { %p4392_p3 = por %p4391_p2, %p4390_p1 }
 0xc3c   :  { %v2907_v44 = vadd.f32 %v2905_v52, %v2671_v56 }
 0xc3d   :  { %p4393_p4 = pnand %p4392_p3, %p4386_p0 }
 0xc3e   :  { %3933 = vmatpush3.msra.mxu0 %v2907_v44 }
 0xc3f   :  { %3934 = vmatprep.subr.mxu0 %v5182_v51 }
 0xc40   :  { %3935 = vmatpush3.msra.mxu0 %v2906_v31 }
 0xc41   :  { %3937 = vmatmul.mubr.msk.f32.vlgmr.msra.gmra.mxu0 %vm991_vm4, %v5063_v22 }
 0xc42   :  { %3941 = vmatprep.mubr.msk.f32.mxu0 %vm2407_vm11, %v5066_v6 }
 0xd01   :  { %v2977_v33 = vpop.f32.mrf.mxu0 }
 0xd02   :  { %3939 = vmatprep.subr.msk.mxu0 %vm629_vm1, %v2977_v33 }
 0xd03   :  { %v3938_v10 = vpop.f32.mrf.mxu0  ;;  %3940 = vmatpush3.msk.msra.mxu0 %vm629_vm1, %v2977_v33 }
 0xd04   :  { %3942 = vmatmul.mubr.msk.f32.vlgmr.msra.gmra.mxu0 %vm2407_vm11, %v5072_v8 }
 0xd05   :  { %3953 = vmatprep.mubr.msk.f32.mxu0 %vm2407_vm11, %v5066_v6 }
 0xdc4   :  { %v3943_v24 = vpop.f32.mrf.mxu0 }
 0xdc5   :  { %v3066_v36 = vmul.f32 %v3943_v24, %v3443_v18 }
 0xdc6   :  { %v3050_v14 = vpop.f32.mrf.mxu0 }
 0xdc7   :  { %v3068_v26 = vsub.f32 %v2907_v44, %v3066_v36  ;;  %v3065_v27 = vmul.f32 %v3443_v18, %v3050_v14 }
 0xdc9   :  { %v3070_v29 = vmul.f32 %v3068_v26, %v3068_v26  ;;  %v3067_v59 = vsub.f32 %v2906_v31, %v3065_v27 }
 0xdcb   :  { %v3069_v30 = vmul.f32 %v3067_v59, %v3067_v59  ;;  %3945 = vmatpush3.msra.mxu1 %v3070_v29 }
 0xdcc   :  { %3946 = vmatprep.subr.mxu1 %v5182_v51  ;;  %v3445_v51 = vld [vmem:[%s5195_s15] ss:$0 sm:$0xff] }
 0xdcd   :  { %3947 = vmatpush3.msra.mxu1 %v3069_v30  ;;  %v3148_v38 = vmul.f32 %v3445_v51, %v3068_v26 }
 0xdce   :  { %3949 = vmatmul.mubr.msk.f32.vlgmr.msra.gmra.mxu1 %vm991_vm4, %v5063_v22  ;;  %v3147_v22 = vmul.f32 %v3445_v51, %v3067_v59 }
 0xe8e   :  { %v3137_v63 = vpop.f32.mrf.mxu1 }
 0xe8f   :  { %3951 = vmatprep.subr.msk.mxu0 %vm629_vm1, %v3137_v63 }
 0xe90   :  { %v3950_v6 = vpop.f32.mrf.mxu1  ;;  %3952 = vmatpush3.msk.msra.mxu0 %vm629_vm1, %v3137_v63 }
 0xe91   :  { %3954 = vmatmul.mubr.msk.f32.vlgmr.msra.gmra.mxu0 %vm2407_vm11, %v5072_v8 }
 0xf51   :  { %v3955_v61 = vpop.f32.mrf.mxu0 }
 0xf52   :  { %v3224_v12 = vadd.f32 1e-05, %v3955_v61 }
 0xf53   :  { %v3218_v23 = vpop.f32.mrf.mxu0 }
 0xf54   :  { %4159 = vrsqrt.f32 %v3224_v12  ;;  %v3219_v25 = vadd.f32 1e-05, %v3218_v23 }
 0xf56   :  { %4161 = vrsqrt.f32 %v3219_v25 }
 0xf61   :  { %v4160_v28 = vpop.eup %4159 }
 0xf62   :  { %v3230_v1 = vmul.f32 %v4160_v28, %v3148_v38 }
 0xf63   :  { %v4162_v58 = vpop.eup %4161 }
 0xf64   :  { %v3229_v13 = vmul.f32 %v4162_v58, %v3147_v22  ;;  %v3238_v19 = vadd.f32 %v3449_v62, %v3230_v1 }
 0xf66   :  { %v3237_v21 = vadd.f32 %v3449_v62, %v3229_v13  ;;  %3240 = vst [vmem:[#allocation24 + $0x8] sm:$0xff] %v3238_v19 }
 0xf68   :  { %3239 = vst [vmem:[#allocation24] sm:$0xff] %v3237_v21 }
 0xf69   :  { %4396 = shalt.err (!%p4393_p4)
}
 0xf6a   :  { %3252 = dma.vmem_to_hbm [thread:$0]  %s3247_s18, 256, %s4630_s29, [#allocation8], %s4460_s4, %s4460_s4, %s4461_s2  }
 0xf6b   :  { %4417 = dma.done.wait [#allocation8], 256  }
 0xf6c   :  { %4418 = vsyncadd [#allocation8], 4294967040 }
 0xf6d   :  { %3260 = vsyncpa [#allocation7], 1 }
 0xf6e   :  { %3261 = vsyncpa [#allocation10], 1 }
 0xf6f   :  { %3262 = vsyncpa [#allocation13], 1 }
 0xf70   :  { %3263 = vsyncpa [#allocation16], 1 }
 0xf71   :  { %3264 = vsyncpa [#allocation19], 1 }
 0xf72   :  { %3265 = vsyncpa [#allocation22], 1 }
 0xf73   :  { %3266 = vsyncpa [#allocation8], 1 }

</bundles_post_ra>
